<compile_context>
chip_gen: v5e
topology: v5e:2x2
jax: 0.10.0
libtpu: 0.0.40
codegen_flags: <defaults>
</compile_context>

<pallas_src>
import functools

import jax
import jax.numpy as jnp
import numpy as np
from jax.experimental import pallas as pl
from jax.experimental.pallas import tpu as pltpu

NUM_CROSS = 3   # numcross
NUM_CONV1 = 2   # numconv1
N_HEADS = 4
LN_EPS = 1e-5


# --------------------------------------------------------------------------
# Fused Pallas kernel: one batch element through the whole SelfAttBlock
# --------------------------------------------------------------------------
def _block_kernel(x_ref, wqkv_ref, bqkv_ref, wo_ref, bo_ref, gamma_ref,
                  beta_ref, cw_ref, cb_ref, o_ref, *,
                  n_heads, num_cross, num_conv1):
    y = x_ref[0]                                   # (S, D) f32
    S, D = y.shape
    hd = D // n_heads
    inv_d = 1.0 / D

    for i in range(num_cross):                     # static layer loop
        # ---------- self-attention: qkv = x @ [Wq*s | Wk | Wv] + [bq*s | bk | bv]
        x = y
        qkv = jnp.dot(x.astype(jnp.bfloat16), wqkv_ref[i],
                      preferred_element_type=jnp.float32) + bqkv_ref[i]  # (S, 3D)

        proj = jnp.zeros((S, D), jnp.float32)
        for h in range(n_heads):                   # static head loop
            lo = h * hd
            qh = qkv[:, lo:lo + hd]
            kh = qkv[:, D + lo:D + lo + hd]
            vh = qkv[:, 2 * D + lo:2 * D + lo + hd]
            # scores[q, k] = <qh[q], kh[k]>  (1/sqrt(hd) already folded into Wq/bq)
            s = jax.lax.dot_general(
                qh.astype(jnp.bfloat16), kh.astype(jnp.bfloat16),
                dimension_numbers=(((1,), (1,)), ((), ())),
                preferred_element_type=jnp.float32)          # (S, S)
            s = s - jnp.max(s, axis=-1, keepdims=True)
            p = jnp.exp(s)
            p = p * pl.reciprocal(jnp.sum(p, axis=-1, keepdims=True),
                                  approx=True)
            oh = jnp.dot(p.astype(jnp.bfloat16), vh.astype(jnp.bfloat16),
                         preferred_element_type=jnp.float32)  # (S, hd)
            # fold this head's output straight into the output projection
            proj = proj + jnp.dot(oh.astype(jnp.bfloat16), wo_ref[i, h],
                                  preferred_element_type=jnp.float32)

        # ---------- residual + LayerNorm (one-pass statistics)
        yr = x + proj + bo_ref[i]
        mu = jnp.sum(yr, axis=-1, keepdims=True) * inv_d
        ms = jnp.sum(yr * yr, axis=-1, keepdims=True) * inv_d
        inv_std = jax.lax.rsqrt(ms - mu * mu + LN_EPS)
        y = (yr - mu) * inv_std * gamma_ref[i] + beta_ref[i]

        # ---------- Conv1d(kernel=3, padding=1) over the sequence axis
        if i < num_conv1:
            zrow = jnp.zeros((1, D), dtype=y.dtype)
            x_prev = jnp.concatenate([zrow, y[:-1, :]], axis=0)   # x[s-1], 0-padded
            x_next = jnp.concatenate([y[1:, :], zrow], axis=0)    # x[s+1], 0-padded
            xcat = jnp.concatenate([x_prev, y, x_next], axis=-1)  # (S, 3D)
            y = jnp.dot(xcat.astype(jnp.bfloat16), cw_ref[i],
                        preferred_element_type=jnp.float32) + cb_ref[i]

    o_ref[0] = y


# --------------------------------------------------------------------------
# Wrapper: parameter packing + single pallas_call over the batch
# --------------------------------------------------------------------------
def _pack_params(cross_params, conv_params, D):
    hd = D // N_HEADS
    sc = 1.0 / np.sqrt(hd)        # softmax scale folded into Wq / bq
    wqkv = jnp.stack([jnp.concatenate([p["wq"] * sc, p["wk"], p["wv"]], axis=1)
                      for p in cross_params]).astype(jnp.bfloat16)      # (NC, D, 3D)
    bqkv = jnp.stack([jnp.concatenate([p["bq"] * sc, p["bk"], p["bv"]], axis=1)
                      for p in cross_params])                            # (NC, 1, 3D) f32
    # Wo laid out per head: (NC, H, hd, D), bf16, indexed only on leading dims
    wo = jnp.stack([p["wo"].reshape(N_HEADS, hd, D)
                    for p in cross_params]).astype(jnp.bfloat16)         # (NC, H, hd, D)
    bo = jnp.stack([p["bo"] for p in cross_params])                      # (NC, 1, D)
    gamma = jnp.stack([p["gamma"] for p in cross_params])                # (NC, 1, D)
    beta = jnp.stack([p["beta"] for p in cross_params])                  # (NC, 1, D)
    cw = jnp.stack([jnp.concatenate([p["w0"], p["w1"], p["w2"]], axis=0)
                    for p in conv_params]).astype(jnp.bfloat16)          # (NV, 3D, D)
    cb = jnp.stack([p["b"] for p in conv_params])                        # (NV, 1, D)
    return wqkv, bqkv, wo, bo, gamma, beta, cw, cb


def self_att_block(x, cross_params, conv_params):
    """Forward of SelfAttBlock: zip(crosslayers, conv1layers + Nones), fused."""
    B, S, D = x.shape
    assert D % N_HEADS == 0
    packed = _pack_params(cross_params, conv_params, D)

    xspec = pl.BlockSpec((1, S, D), lambda b: (b, 0, 0))

    def _const_spec(arr):
        return pl.BlockSpec(arr.shape, lambda b, _nd=arr.ndim: (0,) * _nd)

    wspecs = [_const_spec(a) for a in packed]

    return pl.pallas_call(
        functools.partial(_block_kernel, n_heads=N_HEADS,
                          num_cross=NUM_CROSS, num_conv1=NUM_CONV1),
        out_shape=jax.ShapeDtypeStruct((B, S, D), jnp.float32),
        grid=(B,),
        in_specs=[xspec] + wspecs,
        out_specs=xspec,
        compiler_params=pltpu.CompilerParams(
            dimension_semantics=("parallel",)),
    )(x, *packed)


# --------------------------------------------------------------------------
# Pure-JAX f32 reference (sanity check of the kernel)
# --------------------------------------------------------------------------
def _ref_self_att(x, p):
    B, S, D = x.shape
    hd = D // N_HEADS
    q = x @ p["wq"] + p["bq"][0]
    k = x @ p["wk"] + p["bk"][0]
    v = x @ p["wv"] + p["bv"][0]
    qh = q.reshape(B, S, N_HEADS, hd)
    kh = k.reshape(B, S, N_HEADS, hd)
    vh = v.reshape(B, S, N_HEADS, hd)
    s = jnp.einsum("bqhd,bkhd->bhqk", qh, kh) / np.sqrt(hd)
    a = jax.nn.softmax(s, axis=-1)
    o = jnp.einsum("bhqk,bkhd->bqhd", a, vh).reshape(B, S, D)
    y = x + (o @ p["wo"] + p["bo"][0])
    mu = y.mean(-1, keepdims=True)
    var = ((y - mu) ** 2).mean(-1, keepdims=True)
    return (y - mu) / jnp.sqrt(var + LN_EPS) * p["gamma"][0] + p["beta"][0]


def _ref_conv(x, p):
    B, S, D = x.shape
    xp = jnp.pad(x, ((0, 0), (1, 1), (0, 0)))
    return (xp[:, :S] @ p["w0"] + xp[:, 1:S + 1] @ p["w1"]
            + xp[:, 2:S + 2] @ p["w2"] + p["b"][0])


def _ref_block(x, cross_params, conv_params):
    for i in range(NUM_CROSS):
        x = _ref_self_att(x, cross_params[i])
        if i < NUM_CONV1:
            x = _ref_conv(x, conv_params[i])
    return x


# --------------------------------------------------------------------------
# Deterministic parameter init + main
# --------------------------------------------------------------------------
def _init_params(key, D):
    keys = iter(jax.random.split(key, 128))
    nk = lambda: next(keys)
    wscale = 1.0 / np.sqrt(D)
    cross_params = []
    for _ in range(NUM_CROSS):
        cross_params.append(dict(
            wq=jax.random.normal(nk(), (D, D), jnp.float32) * wscale,
            wk=jax.random.normal(nk(), (D, D), jnp.float32) * wscale,
            wv=jax.random.normal(nk(), (D, D), jnp.float32) * wscale,
            wo=jax.random.normal(nk(), (D, D), jnp.float32) * wscale,
            bq=jax.random.normal(nk(), (1, D), jnp.float32) * 0.02,
            bk=jax.random.normal(nk(), (1, D), jnp.float32) * 0.02,
            bv=jax.random.normal(nk(), (1, D), jnp.float32) * 0.02,
            bo=jax.random.normal(nk(), (1, D), jnp.float32) * 0.02,
            gamma=jnp.ones((1, D), jnp.float32),
            beta=jnp.zeros((1, D), jnp.float32),
        ))
    cscale = 1.0 / np.sqrt(3 * D)
    conv_params = []
    for _ in range(NUM_CONV1):
        conv_params.append(dict(
            w0=jax.random.normal(nk(), (D, D), jnp.float32) * cscale,
            w1=jax.random.normal(nk(), (D, D), jnp.float32) * cscale,
            w2=jax.random.normal(nk(), (D, D), jnp.float32) * cscale,
            b=jax.random.normal(nk(), (1, D), jnp.float32) * 0.02,
        ))
    return cross_params, conv_params


if __name__ == "__main__":
    B, S, D = 2, 8, 32
    key = jax.random.PRNGKey(0)
    kx, kp = jax.random.split(key)
    x = jax.random.normal(kx, (B, S, D), jnp.float32)
    cross_params, conv_params = _init_params(kp, D)

    out = jax.block_until_ready(self_att_block(x, cross_params, conv_params))

    ref = jax.block_until_ready(_ref_block(x, cross_params, conv_params))
    np.testing.assert_allclose(np.asarray(out), np.asarray(ref),
                               rtol=5e-2, atol=5e-2)

    print("KERNEL_OK")
</pallas_src>

<mosaic_0001>
module attributes {stable_mosaic.version = 11 : i64} {
  func.func @_block_kernel(%arg0: i32, %arg1: memref<1x8x32xf32, #tpu.memory_space<vmem>>, %arg2: memref<3x32x96xbf16, #tpu.memory_space<vmem>>, %arg3: memref<3x1x96xf32, #tpu.memory_space<vmem>>, %arg4: memref<3x4x8x32xbf16, #tpu.memory_space<vmem>>, %arg5: memref<3x1x32xf32, #tpu.memory_space<vmem>>, %arg6: memref<3x1x32xf32, #tpu.memory_space<vmem>>, %arg7: memref<3x1x32xf32, #tpu.memory_space<vmem>>, %arg8: memref<2x96x32xbf16, #tpu.memory_space<vmem>>, %arg9: memref<2x1x32xf32, #tpu.memory_space<vmem>>, %arg10: memref<1x8x32xf32, #tpu.memory_space<vmem>>) attributes {dimension_semantics = [#tpu.dimension_semantics<parallel>], iteration_bounds = array<i64: 2>, scalar_prefetch = 0 : i64, scratch_operands = 0 : i64, tpu.core_type = #tpu.core_type<tc>, window_params = [{transform_indices = @transform_0, window_bounds = array<i64: 1, 8, 32>}, {pipeline_mode = #tpu.pipeline_mode<synchronous>, transform_indices = @transform_1, window_bounds = array<i64: 3, 32, 96>}, {pipeline_mode = #tpu.pipeline_mode<synchronous>, transform_indices = @transform_2, window_bounds = array<i64: 3, 1, 96>}, {pipeline_mode = #tpu.pipeline_mode<synchronous>, transform_indices = @transform_3, window_bounds = array<i64: 3, 4, 8, 32>}, {pipeline_mode = #tpu.pipeline_mode<synchronous>, transform_indices = @transform_4, window_bounds = array<i64: 3, 1, 32>}, {pipeline_mode = #tpu.pipeline_mode<synchronous>, transform_indices = @transform_5, window_bounds = array<i64: 3, 1, 32>}, {pipeline_mode = #tpu.pipeline_mode<synchronous>, transform_indices = @transform_6, window_bounds = array<i64: 3, 1, 32>}, {pipeline_mode = #tpu.pipeline_mode<synchronous>, transform_indices = @transform_7, window_bounds = array<i64: 2, 96, 32>}, {pipeline_mode = #tpu.pipeline_mode<synchronous>, transform_indices = @transform_8, window_bounds = array<i64: 2, 1, 32>}, {transform_indices = @transform_9, window_bounds = array<i64: 1, 8, 32>}]} {
    %c0 = arith.constant 0 : index
    %c0_0 = arith.constant 0 : index
    %c0_1 = arith.constant 0 : index
    %0 = vector.load %arg1[%c0, %c0_0, %c0_1] : memref<1x8x32xf32, #tpu.memory_space<vmem>>, vector<1x8x32xf32>
    %1 = vector.shape_cast %0 : vector<1x8x32xf32> to vector<8x32xf32>
    %2 = arith.truncf %1 : vector<8x32xf32> to vector<8x32xbf16>
    %c0_2 = arith.constant 0 : index
    %c0_3 = arith.constant 0 : index
    %c0_4 = arith.constant 0 : index
    %3 = vector.load %arg2[%c0_2, %c0_3, %c0_4] : memref<3x32x96xbf16, #tpu.memory_space<vmem>>, vector<1x32x96xbf16>
    %4 = vector.shape_cast %3 : vector<1x32x96xbf16> to vector<32x96xbf16>
    %cst = arith.constant dense<0.000000e+00> : vector<8x96xf32>
    %5 = tpu.matmul %2, %4, %cst {dimension_numbers = #tpu.dot_dimension_numbers<[1], [0], [0], [1], [0, 0, 1, 1], [], []>} : vector<8x32xbf16>, vector<32x96xbf16>, vector<8x96xf32> -> vector<8x96xf32>
    %c0_5 = arith.constant 0 : index
    %c0_6 = arith.constant 0 : index
    %c0_7 = arith.constant 0 : index
    %6 = vector.load %arg3[%c0_5, %c0_6, %c0_7] : memref<3x1x96xf32, #tpu.memory_space<vmem>>, vector<1x1x96xf32>
    %7 = vector.shape_cast %6 : vector<1x1x96xf32> to vector<1x96xf32>
    %8 = vector.broadcast %7 : vector<1x96xf32> to vector<8x96xf32>
    %9 = arith.addf %5, %8 : vector<8x96xf32>
    %cst_8 = arith.constant 0.000000e+00 : f32
    %10 = vector.broadcast %cst_8 : f32 to vector<8x32xf32>
    %11 = vector.extract_strided_slice %9 {offsets = [0, 0], sizes = [8, 8], strides = [1, 1]} : vector<8x96xf32> to vector<8x8xf32>
    %12 = vector.extract_strided_slice %9 {offsets = [0, 32], sizes = [8, 8], strides = [1, 1]} : vector<8x96xf32> to vector<8x8xf32>
    %13 = vector.extract_strided_slice %9 {offsets = [0, 64], sizes = [8, 8], strides = [1, 1]} : vector<8x96xf32> to vector<8x8xf32>
    %14 = arith.truncf %11 : vector<8x8xf32> to vector<8x8xbf16>
    %15 = arith.truncf %12 : vector<8x8xf32> to vector<8x8xbf16>
    %cst_9 = arith.constant dense<0.000000e+00> : vector<8x8xf32>
    %16 = tpu.matmul %14, %15, %cst_9 {dimension_numbers = #tpu.dot_dimension_numbers<[1], [1], [0], [0], [0, 0, 1, 0], [], []>} : vector<8x8xbf16>, vector<8x8xbf16>, vector<8x8xf32> -> vector<8x8xf32>
    %cst_10 = arith.constant dense<0xFF800000> : vector<8xf32>
    %17 = vector.multi_reduction <maximumf>, %16, %cst_10 [1] : vector<8x8xf32> to vector<8xf32>
    %18 = vector.shape_cast %17 : vector<8xf32> to vector<8x1xf32>
    %19 = vector.broadcast %18 : vector<8x1xf32> to vector<8x8xf32>
    %20 = arith.subf %16, %19 : vector<8x8xf32>
    %21 = math.exp %20 : vector<8x8xf32>
    %cst_11 = arith.constant dense<0.000000e+00> : vector<8xf32>
    %22 = vector.multi_reduction <add>, %21, %cst_11 [1] : vector<8x8xf32> to vector<8xf32>
    %23 = vector.shape_cast %22 : vector<8xf32> to vector<8x1xf32>
    %24 = tpu.reciprocal %23 {approx = true} : vector<8x1xf32> -> vector<8x1xf32>
    %25 = vector.broadcast %24 : vector<8x1xf32> to vector<8x8xf32>
    %26 = arith.mulf %21, %25 : vector<8x8xf32>
    %27 = arith.truncf %26 : vector<8x8xf32> to vector<8x8xbf16>
    %28 = arith.truncf %13 : vector<8x8xf32> to vector<8x8xbf16>
    %cst_12 = arith.constant dense<0.000000e+00> : vector<8x8xf32>
    %29 = tpu.matmul %27, %28, %cst_12 {dimension_numbers = #tpu.dot_dimension_numbers<[1], [0], [0], [1], [0, 0, 1, 1], [], []>} : vector<8x8xbf16>, vector<8x8xbf16>, vector<8x8xf32> -> vector<8x8xf32>
    %30 = arith.truncf %29 : vector<8x8xf32> to vector<8x8xbf16>
    %c0_13 = arith.constant 0 : index
    %c0_14 = arith.constant 0 : index
    %c0_15 = arith.constant 0 : index
    %c0_16 = arith.constant 0 : index
    %31 = vector.load %arg4[%c0_13, %c0_14, %c0_15, %c0_16] : memref<3x4x8x32xbf16, #tpu.memory_space<vmem>>, vector<1x1x8x32xbf16>
    %32 = vector.shape_cast %31 : vector<1x1x8x32xbf16> to vector<8x32xbf16>
    %cst_17 = arith.constant dense<0.000000e+00> : vector<8x32xf32>
    %33 = tpu.matmul %30, %32, %cst_17 {dimension_numbers = #tpu.dot_dimension_numbers<[1], [0], [0], [1], [0, 0, 1, 1], [], []>} : vector<8x8xbf16>, vector<8x32xbf16>, vector<8x32xf32> -> vector<8x32xf32>
    %34 = arith.addf %10, %33 : vector<8x32xf32>
    %35 = vector.extract_strided_slice %9 {offsets = [0, 8], sizes = [8, 8], strides = [1, 1]} : vector<8x96xf32> to vector<8x8xf32>
    %36 = vector.extract_strided_slice %9 {offsets = [0, 40], sizes = [8, 8], strides = [1, 1]} : vector<8x96xf32> to vector<8x8xf32>
    %37 = vector.extract_strided_slice %9 {offsets = [0, 72], sizes = [8, 8], strides = [1, 1]} : vector<8x96xf32> to vector<8x8xf32>
    %38 = arith.truncf %35 : vector<8x8xf32> to vector<8x8xbf16>
    %39 = arith.truncf %36 : vector<8x8xf32> to vector<8x8xbf16>
    %cst_18 = arith.constant dense<0.000000e+00> : vector<8x8xf32>
    %40 = tpu.matmul %38, %39, %cst_18 {dimension_numbers = #tpu.dot_dimension_numbers<[1], [1], [0], [0], [0, 0, 1, 0], [], []>} : vector<8x8xbf16>, vector<8x8xbf16>, vector<8x8xf32> -> vector<8x8xf32>
    %cst_19 = arith.constant dense<0xFF800000> : vector<8xf32>
    %41 = vector.multi_reduction <maximumf>, %40, %cst_19 [1] : vector<8x8xf32> to vector<8xf32>
    %42 = vector.shape_cast %41 : vector<8xf32> to vector<8x1xf32>
    %43 = vector.broadcast %42 : vector<8x1xf32> to vector<8x8xf32>
    %44 = arith.subf %40, %43 : vector<8x8xf32>
    %45 = math.exp %44 : vector<8x8xf32>
    %cst_20 = arith.constant dense<0.000000e+00> : vector<8xf32>
    %46 = vector.multi_reduction <add>, %45, %cst_20 [1] : vector<8x8xf32> to vector<8xf32>
    %47 = vector.shape_cast %46 : vector<8xf32> to vector<8x1xf32>
    %48 = tpu.reciprocal %47 {approx = true} : vector<8x1xf32> -> vector<8x1xf32>
    %49 = vector.broadcast %48 : vector<8x1xf32> to vector<8x8xf32>
    %50 = arith.mulf %45, %49 : vector<8x8xf32>
    %51 = arith.truncf %50 : vector<8x8xf32> to vector<8x8xbf16>
    %52 = arith.truncf %37 : vector<8x8xf32> to vector<8x8xbf16>
    %cst_21 = arith.constant dense<0.000000e+00> : vector<8x8xf32>
    %53 = tpu.matmul %51, %52, %cst_21 {dimension_numbers = #tpu.dot_dimension_numbers<[1], [0], [0], [1], [0, 0, 1, 1], [], []>} : vector<8x8xbf16>, vector<8x8xbf16>, vector<8x8xf32> -> vector<8x8xf32>
    %54 = arith.truncf %53 : vector<8x8xf32> to vector<8x8xbf16>
    %c0_22 = arith.constant 0 : index
    %c1 = arith.constant 1 : index
    %c0_23 = arith.constant 0 : index
    %c0_24 = arith.constant 0 : index
    %55 = vector.load %arg4[%c0_22, %c1, %c0_23, %c0_24] : memref<3x4x8x32xbf16, #tpu.memory_space<vmem>>, vector<1x1x8x32xbf16>
    %56 = vector.shape_cast %55 : vector<1x1x8x32xbf16> to vector<8x32xbf16>
    %cst_25 = arith.constant dense<0.000000e+00> : vector<8x32xf32>
    %57 = tpu.matmul %54, %56, %cst_25 {dimension_numbers = #tpu.dot_dimension_numbers<[1], [0], [0], [1], [0, 0, 1, 1], [], []>} : vector<8x8xbf16>, vector<8x32xbf16>, vector<8x32xf32> -> vector<8x32xf32>
    %58 = arith.addf %34, %57 : vector<8x32xf32>
    %59 = vector.extract_strided_slice %9 {offsets = [0, 16], sizes = [8, 8], strides = [1, 1]} : vector<8x96xf32> to vector<8x8xf32>
    %60 = vector.extract_strided_slice %9 {offsets = [0, 48], sizes = [8, 8], strides = [1, 1]} : vector<8x96xf32> to vector<8x8xf32>
    %61 = vector.extract_strided_slice %9 {offsets = [0, 80], sizes = [8, 8], strides = [1, 1]} : vector<8x96xf32> to vector<8x8xf32>
    %62 = arith.truncf %59 : vector<8x8xf32> to vector<8x8xbf16>
    %63 = arith.truncf %60 : vector<8x8xf32> to vector<8x8xbf16>
    %cst_26 = arith.constant dense<0.000000e+00> : vector<8x8xf32>
    %64 = tpu.matmul %62, %63, %cst_26 {dimension_numbers = #tpu.dot_dimension_numbers<[1], [1], [0], [0], [0, 0, 1, 0], [], []>} : vector<8x8xbf16>, vector<8x8xbf16>, vector<8x8xf32> -> vector<8x8xf32>
    %cst_27 = arith.constant dense<0xFF800000> : vector<8xf32>
    %65 = vector.multi_reduction <maximumf>, %64, %cst_27 [1] : vector<8x8xf32> to vector<8xf32>
    %66 = vector.shape_cast %65 : vector<8xf32> to vector<8x1xf32>
    %67 = vector.broadcast %66 : vector<8x1xf32> to vector<8x8xf32>
    %68 = arith.subf %64, %67 : vector<8x8xf32>
    %69 = math.exp %68 : vector<8x8xf32>
    %cst_28 = arith.constant dense<0.000000e+00> : vector<8xf32>
    %70 = vector.multi_reduction <add>, %69, %cst_28 [1] : vector<8x8xf32> to vector<8xf32>
    %71 = vector.shape_cast %70 : vector<8xf32> to vector<8x1xf32>
    %72 = tpu.reciprocal %71 {approx = true} : vector<8x1xf32> -> vector<8x1xf32>
    %73 = vector.broadcast %72 : vector<8x1xf32> to vector<8x8xf32>
    %74 = arith.mulf %69, %73 : vector<8x8xf32>
    %75 = arith.truncf %74 : vector<8x8xf32> to vector<8x8xbf16>
    %76 = arith.truncf %61 : vector<8x8xf32> to vector<8x8xbf16>
    %cst_29 = arith.constant dense<0.000000e+00> : vector<8x8xf32>
    %77 = tpu.matmul %75, %76, %cst_29 {dimension_numbers = #tpu.dot_dimension_numbers<[1], [0], [0], [1], [0, 0, 1, 1], [], []>} : vector<8x8xbf16>, vector<8x8xbf16>, vector<8x8xf32> -> vector<8x8xf32>
    %78 = arith.truncf %77 : vector<8x8xf32> to vector<8x8xbf16>
    %c0_30 = arith.constant 0 : index
    %c2 = arith.constant 2 : index
    %c0_31 = arith.constant 0 : index
    %c0_32 = arith.constant 0 : index
    %79 = vector.load %arg4[%c0_30, %c2, %c0_31, %c0_32] : memref<3x4x8x32xbf16, #tpu.memory_space<vmem>>, vector<1x1x8x32xbf16>
    %80 = vector.shape_cast %79 : vector<1x1x8x32xbf16> to vector<8x32xbf16>
    %cst_33 = arith.constant dense<0.000000e+00> : vector<8x32xf32>
    %81 = tpu.matmul %78, %80, %cst_33 {dimension_numbers = #tpu.dot_dimension_numbers<[1], [0], [0], [1], [0, 0, 1, 1], [], []>} : vector<8x8xbf16>, vector<8x32xbf16>, vector<8x32xf32> -> vector<8x32xf32>
    %82 = arith.addf %58, %81 : vector<8x32xf32>
    %83 = vector.extract_strided_slice %9 {offsets = [0, 24], sizes = [8, 8], strides = [1, 1]} : vector<8x96xf32> to vector<8x8xf32>
    %84 = vector.extract_strided_slice %9 {offsets = [0, 56], sizes = [8, 8], strides = [1, 1]} : vector<8x96xf32> to vector<8x8xf32>
    %85 = vector.extract_strided_slice %9 {offsets = [0, 88], sizes = [8, 8], strides = [1, 1]} : vector<8x96xf32> to vector<8x8xf32>
    %86 = arith.truncf %83 : vector<8x8xf32> to vector<8x8xbf16>
    %87 = arith.truncf %84 : vector<8x8xf32> to vector<8x8xbf16>
    %cst_34 = arith.constant dense<0.000000e+00> : vector<8x8xf32>
    %88 = tpu.matmul %86, %87, %cst_34 {dimension_numbers = #tpu.dot_dimension_numbers<[1], [1], [0], [0], [0, 0, 1, 0], [], []>} : vector<8x8xbf16>, vector<8x8xbf16>, vector<8x8xf32> -> vector<8x8xf32>
    %cst_35 = arith.constant dense<0xFF800000> : vector<8xf32>
    %89 = vector.multi_reduction <maximumf>, %88, %cst_35 [1] : vector<8x8xf32> to vector<8xf32>
    %90 = vector.shape_cast %89 : vector<8xf32> to vector<8x1xf32>
    %91 = vector.broadcast %90 : vector<8x1xf32> to vector<8x8xf32>
    %92 = arith.subf %88, %91 : vector<8x8xf32>
    %93 = math.exp %92 : vector<8x8xf32>
    %cst_36 = arith.constant dense<0.000000e+00> : vector<8xf32>
    %94 = vector.multi_reduction <add>, %93, %cst_36 [1] : vector<8x8xf32> to vector<8xf32>
    %95 = vector.shape_cast %94 : vector<8xf32> to vector<8x1xf32>
    %96 = tpu.reciprocal %95 {approx = true} : vector<8x1xf32> -> vector<8x1xf32>
    %97 = vector.broadcast %96 : vector<8x1xf32> to vector<8x8xf32>
    %98 = arith.mulf %93, %97 : vector<8x8xf32>
    %99 = arith.truncf %98 : vector<8x8xf32> to vector<8x8xbf16>
    %100 = arith.truncf %85 : vector<8x8xf32> to vector<8x8xbf16>
    %cst_37 = arith.constant dense<0.000000e+00> : vector<8x8xf32>
    %101 = tpu.matmul %99, %100, %cst_37 {dimension_numbers = #tpu.dot_dimension_numbers<[1], [0], [0], [1], [0, 0, 1, 1], [], []>} : vector<8x8xbf16>, vector<8x8xbf16>, vector<8x8xf32> -> vector<8x8xf32>
    %102 = arith.truncf %101 : vector<8x8xf32> to vector<8x8xbf16>
    %c0_38 = arith.constant 0 : index
    %c3 = arith.constant 3 : index
    %c0_39 = arith.constant 0 : index
    %c0_40 = arith.constant 0 : index
    %103 = vector.load %arg4[%c0_38, %c3, %c0_39, %c0_40] : memref<3x4x8x32xbf16, #tpu.memory_space<vmem>>, vector<1x1x8x32xbf16>
    %104 = vector.shape_cast %103 : vector<1x1x8x32xbf16> to vector<8x32xbf16>
    %cst_41 = arith.constant dense<0.000000e+00> : vector<8x32xf32>
    %105 = tpu.matmul %102, %104, %cst_41 {dimension_numbers = #tpu.dot_dimension_numbers<[1], [0], [0], [1], [0, 0, 1, 1], [], []>} : vector<8x8xbf16>, vector<8x32xbf16>, vector<8x32xf32> -> vector<8x32xf32>
    %106 = arith.addf %82, %105 : vector<8x32xf32>
    %107 = arith.addf %1, %106 : vector<8x32xf32>
    %c0_42 = arith.constant 0 : index
    %c0_43 = arith.constant 0 : index
    %c0_44 = arith.constant 0 : index
    %108 = vector.load %arg5[%c0_42, %c0_43, %c0_44] : memref<3x1x32xf32, #tpu.memory_space<vmem>>, vector<1x1x32xf32>
    %109 = vector.shape_cast %108 : vector<1x1x32xf32> to vector<1x32xf32>
    %110 = vector.broadcast %109 : vector<1x32xf32> to vector<8x32xf32>
    %111 = arith.addf %107, %110 : vector<8x32xf32>
    %cst_45 = arith.constant dense<0.000000e+00> : vector<8xf32>
    %112 = vector.multi_reduction <add>, %111, %cst_45 [1] : vector<8x32xf32> to vector<8xf32>
    %113 = vector.shape_cast %112 : vector<8xf32> to vector<8x1xf32>
    %cst_46 = arith.constant 3.125000e-02 : f32
    %114 = vector.broadcast %cst_46 : f32 to vector<8x1xf32>
    %115 = arith.mulf %113, %114 : vector<8x1xf32>
    %116 = arith.mulf %111, %111 : vector<8x32xf32>
    %cst_47 = arith.constant dense<0.000000e+00> : vector<8xf32>
    %117 = vector.multi_reduction <add>, %116, %cst_47 [1] : vector<8x32xf32> to vector<8xf32>
    %118 = vector.shape_cast %117 : vector<8xf32> to vector<8x1xf32>
    %cst_48 = arith.constant 3.125000e-02 : f32
    %119 = vector.broadcast %cst_48 : f32 to vector<8x1xf32>
    %120 = arith.mulf %118, %119 : vector<8x1xf32>
    %121 = arith.mulf %115, %115 : vector<8x1xf32>
    %122 = arith.subf %120, %121 : vector<8x1xf32>
    %cst_49 = arith.constant 9.99999974E-6 : f32
    %123 = vector.broadcast %cst_49 : f32 to vector<8x1xf32>
    %124 = arith.addf %122, %123 : vector<8x1xf32>
    %125 = math.rsqrt %124 : vector<8x1xf32>
    %126 = vector.broadcast %115 : vector<8x1xf32> to vector<8x32xf32>
    %127 = arith.subf %111, %126 : vector<8x32xf32>
    %128 = vector.broadcast %125 : vector<8x1xf32> to vector<8x32xf32>
    %129 = arith.mulf %127, %128 : vector<8x32xf32>
    %c0_50 = arith.constant 0 : index
    %c0_51 = arith.constant 0 : index
    %c0_52 = arith.constant 0 : index
    %130 = vector.load %arg6[%c0_50, %c0_51, %c0_52] : memref<3x1x32xf32, #tpu.memory_space<vmem>>, vector<1x1x32xf32>
    %131 = vector.shape_cast %130 : vector<1x1x32xf32> to vector<1x32xf32>
    %132 = vector.broadcast %131 : vector<1x32xf32> to vector<8x32xf32>
    %133 = arith.mulf %129, %132 : vector<8x32xf32>
    %c0_53 = arith.constant 0 : index
    %c0_54 = arith.constant 0 : index
    %c0_55 = arith.constant 0 : index
    %134 = vector.load %arg7[%c0_53, %c0_54, %c0_55] : memref<3x1x32xf32, #tpu.memory_space<vmem>>, vector<1x1x32xf32>
    %135 = vector.shape_cast %134 : vector<1x1x32xf32> to vector<1x32xf32>
    %136 = vector.broadcast %135 : vector<1x32xf32> to vector<8x32xf32>
    %137 = arith.addf %133, %136 : vector<8x32xf32>
    %cst_56 = arith.constant 0.000000e+00 : f32
    %138 = vector.broadcast %cst_56 : f32 to vector<1x32xf32>
    %139 = vector.extract_strided_slice %137 {offsets = [0, 0], sizes = [7, 32], strides = [1, 1]} : vector<8x32xf32> to vector<7x32xf32>
    %140 = tpu.concatenate %138, %139 in 0 : vector<1x32xf32>, vector<7x32xf32> -> vector<8x32xf32>
    %141 = vector.extract_strided_slice %137 {offsets = [1, 0], sizes = [7, 32], strides = [1, 1]} : vector<8x32xf32> to vector<7x32xf32>
    %142 = tpu.concatenate %141, %138 in 0 : vector<7x32xf32>, vector<1x32xf32> -> vector<8x32xf32>
    %143 = tpu.concatenate %140, %137, %142 in 1 : vector<8x32xf32>, vector<8x32xf32>, vector<8x32xf32> -> vector<8x96xf32>
    %144 = arith.truncf %143 : vector<8x96xf32> to vector<8x96xbf16>
    %c0_57 = arith.constant 0 : index
    %c0_58 = arith.constant 0 : index
    %c0_59 = arith.constant 0 : index
    %145 = vector.load %arg8[%c0_57, %c0_58, %c0_59] : memref<2x96x32xbf16, #tpu.memory_space<vmem>>, vector<1x96x32xbf16>
    %146 = vector.shape_cast %145 : vector<1x96x32xbf16> to vector<96x32xbf16>
    %cst_60 = arith.constant dense<0.000000e+00> : vector<8x32xf32>
    %147 = tpu.matmul %144, %146, %cst_60 {dimension_numbers = #tpu.dot_dimension_numbers<[1], [0], [0], [1], [0, 0, 1, 1], [], []>} : vector<8x96xbf16>, vector<96x32xbf16>, vector<8x32xf32> -> vector<8x32xf32>
    %c0_61 = arith.constant 0 : index
    %c0_62 = arith.constant 0 : index
    %c0_63 = arith.constant 0 : index
    %148 = vector.load %arg9[%c0_61, %c0_62, %c0_63] : memref<2x1x32xf32, #tpu.memory_space<vmem>>, vector<1x1x32xf32>
    %149 = vector.shape_cast %148 : vector<1x1x32xf32> to vector<1x32xf32>
    %150 = vector.broadcast %149 : vector<1x32xf32> to vector<8x32xf32>
    %151 = arith.addf %147, %150 : vector<8x32xf32>
    %152 = arith.truncf %151 : vector<8x32xf32> to vector<8x32xbf16>
    %c1_64 = arith.constant 1 : index
    %c0_65 = arith.constant 0 : index
    %c0_66 = arith.constant 0 : index
    %153 = vector.load %arg2[%c1_64, %c0_65, %c0_66] : memref<3x32x96xbf16, #tpu.memory_space<vmem>>, vector<1x32x96xbf16>
    %154 = vector.shape_cast %153 : vector<1x32x96xbf16> to vector<32x96xbf16>
    %cst_67 = arith.constant dense<0.000000e+00> : vector<8x96xf32>
    %155 = tpu.matmul %152, %154, %cst_67 {dimension_numbers = #tpu.dot_dimension_numbers<[1], [0], [0], [1], [0, 0, 1, 1], [], []>} : vector<8x32xbf16>, vector<32x96xbf16>, vector<8x96xf32> -> vector<8x96xf32>
    %c1_68 = arith.constant 1 : index
    %c0_69 = arith.constant 0 : index
    %c0_70 = arith.constant 0 : index
    %156 = vector.load %arg3[%c1_68, %c0_69, %c0_70] : memref<3x1x96xf32, #tpu.memory_space<vmem>>, vector<1x1x96xf32>
    %157 = vector.shape_cast %156 : vector<1x1x96xf32> to vector<1x96xf32>
    %158 = vector.broadcast %157 : vector<1x96xf32> to vector<8x96xf32>
    %159 = arith.addf %155, %158 : vector<8x96xf32>
    %cst_71 = arith.constant 0.000000e+00 : f32
    %160 = vector.broadcast %cst_71 : f32 to vector<8x32xf32>
    %161 = vector.extract_strided_slice %159 {offsets = [0, 0], sizes = [8, 8], strides = [1, 1]} : vector<8x96xf32> to vector<8x8xf32>
    %162 = vector.extract_strided_slice %159 {offsets = [0, 32], sizes = [8, 8], strides = [1, 1]} : vector<8x96xf32> to vector<8x8xf32>
    %163 = vector.extract_strided_slice %159 {offsets = [0, 64], sizes = [8, 8], strides = [1, 1]} : vector<8x96xf32> to vector<8x8xf32>
    %164 = arith.truncf %161 : vector<8x8xf32> to vector<8x8xbf16>
    %165 = arith.truncf %162 : vector<8x8xf32> to vector<8x8xbf16>
    %cst_72 = arith.constant dense<0.000000e+00> : vector<8x8xf32>
    %166 = tpu.matmul %164, %165, %cst_72 {dimension_numbers = #tpu.dot_dimension_numbers<[1], [1], [0], [0], [0, 0, 1, 0], [], []>} : vector<8x8xbf16>, vector<8x8xbf16>, vector<8x8xf32> -> vector<8x8xf32>
    %cst_73 = arith.constant dense<0xFF800000> : vector<8xf32>
    %167 = vector.multi_reduction <maximumf>, %166, %cst_73 [1] : vector<8x8xf32> to vector<8xf32>
    %168 = vector.shape_cast %167 : vector<8xf32> to vector<8x1xf32>
    %169 = vector.broadcast %168 : vector<8x1xf32> to vector<8x8xf32>
    %170 = arith.subf %166, %169 : vector<8x8xf32>
    %171 = math.exp %170 : vector<8x8xf32>
    %cst_74 = arith.constant dense<0.000000e+00> : vector<8xf32>
    %172 = vector.multi_reduction <add>, %171, %cst_74 [1] : vector<8x8xf32> to vector<8xf32>
    %173 = vector.shape_cast %172 : vector<8xf32> to vector<8x1xf32>
    %174 = tpu.reciprocal %173 {approx = true} : vector<8x1xf32> -> vector<8x1xf32>
    %175 = vector.broadcast %174 : vector<8x1xf32> to vector<8x8xf32>
    %176 = arith.mulf %171, %175 : vector<8x8xf32>
    %177 = arith.truncf %176 : vector<8x8xf32> to vector<8x8xbf16>
    %178 = arith.truncf %163 : vector<8x8xf32> to vector<8x8xbf16>
    %cst_75 = arith.constant dense<0.000000e+00> : vector<8x8xf32>
    %179 = tpu.matmul %177, %178, %cst_75 {dimension_numbers = #tpu.dot_dimension_numbers<[1], [0], [0], [1], [0, 0, 1, 1], [], []>} : vector<8x8xbf16>, vector<8x8xbf16>, vector<8x8xf32> -> vector<8x8xf32>
    %180 = arith.truncf %179 : vector<8x8xf32> to vector<8x8xbf16>
    %c1_76 = arith.constant 1 : index
    %c0_77 = arith.constant 0 : index
    %c0_78 = arith.constant 0 : index
    %c0_79 = arith.constant 0 : index
    %181 = vector.load %arg4[%c1_76, %c0_77, %c0_78, %c0_79] : memref<3x4x8x32xbf16, #tpu.memory_space<vmem>>, vector<1x1x8x32xbf16>
    %182 = vector.shape_cast %181 : vector<1x1x8x32xbf16> to vector<8x32xbf16>
    %cst_80 = arith.constant dense<0.000000e+00> : vector<8x32xf32>
    %183 = tpu.matmul %180, %182, %cst_80 {dimension_numbers = #tpu.dot_dimension_numbers<[1], [0], [0], [1], [0, 0, 1, 1], [], []>} : vector<8x8xbf16>, vector<8x32xbf16>, vector<8x32xf32> -> vector<8x32xf32>
    %184 = arith.addf %160, %183 : vector<8x32xf32>
    %185 = vector.extract_strided_slice %159 {offsets = [0, 8], sizes = [8, 8], strides = [1, 1]} : vector<8x96xf32> to vector<8x8xf32>
    %186 = vector.extract_strided_slice %159 {offsets = [0, 40], sizes = [8, 8], strides = [1, 1]} : vector<8x96xf32> to vector<8x8xf32>
    %187 = vector.extract_strided_slice %159 {offsets = [0, 72], sizes = [8, 8], strides = [1, 1]} : vector<8x96xf32> to vector<8x8xf32>
    %188 = arith.truncf %185 : vector<8x8xf32> to vector<8x8xbf16>
    %189 = arith.truncf %186 : vector<8x8xf32> to vector<8x8xbf16>
    %cst_81 = arith.constant dense<0.000000e+00> : vector<8x8xf32>
    %190 = tpu.matmul %188, %189, %cst_81 {dimension_numbers = #tpu.dot_dimension_numbers<[1], [1], [0], [0], [0, 0, 1, 0], [], []>} : vector<8x8xbf16>, vector<8x8xbf16>, vector<8x8xf32> -> vector<8x8xf32>
    %cst_82 = arith.constant dense<0xFF800000> : vector<8xf32>
    %191 = vector.multi_reduction <maximumf>, %190, %cst_82 [1] : vector<8x8xf32> to vector<8xf32>
    %192 = vector.shape_cast %191 : vector<8xf32> to vector<8x1xf32>
    %193 = vector.broadcast %192 : vector<8x1xf32> to vector<8x8xf32>
    %194 = arith.subf %190, %193 : vector<8x8xf32>
    %195 = math.exp %194 : vector<8x8xf32>
    %cst_83 = arith.constant dense<0.000000e+00> : vector<8xf32>
    %196 = vector.multi_reduction <add>, %195, %cst_83 [1] : vector<8x8xf32> to vector<8xf32>
    %197 = vector.shape_cast %196 : vector<8xf32> to vector<8x1xf32>
    %198 = tpu.reciprocal %197 {approx = true} : vector<8x1xf32> -> vector<8x1xf32>
    %199 = vector.broadcast %198 : vector<8x1xf32> to vector<8x8xf32>
    %200 = arith.mulf %195, %199 : vector<8x8xf32>
    %201 = arith.truncf %200 : vector<8x8xf32> to vector<8x8xbf16>
    %202 = arith.truncf %187 : vector<8x8xf32> to vector<8x8xbf16>
    %cst_84 = arith.constant dense<0.000000e+00> : vector<8x8xf32>
    %203 = tpu.matmul %201, %202, %cst_84 {dimension_numbers = #tpu.dot_dimension_numbers<[1], [0], [0], [1], [0, 0, 1, 1], [], []>} : vector<8x8xbf16>, vector<8x8xbf16>, vector<8x8xf32> -> vector<8x8xf32>
    %204 = arith.truncf %203 : vector<8x8xf32> to vector<8x8xbf16>
    %c1_85 = arith.constant 1 : index
    %c1_86 = arith.constant 1 : index
    %c0_87 = arith.constant 0 : index
    %c0_88 = arith.constant 0 : index
    %205 = vector.load %arg4[%c1_85, %c1_86, %c0_87, %c0_88] : memref<3x4x8x32xbf16, #tpu.memory_space<vmem>>, vector<1x1x8x32xbf16>
    %206 = vector.shape_cast %205 : vector<1x1x8x32xbf16> to vector<8x32xbf16>
    %cst_89 = arith.constant dense<0.000000e+00> : vector<8x32xf32>
    %207 = tpu.matmul %204, %206, %cst_89 {dimension_numbers = #tpu.dot_dimension_numbers<[1], [0], [0], [1], [0, 0, 1, 1], [], []>} : vector<8x8xbf16>, vector<8x32xbf16>, vector<8x32xf32> -> vector<8x32xf32>
    %208 = arith.addf %184, %207 : vector<8x32xf32>
    %209 = vector.extract_strided_slice %159 {offsets = [0, 16], sizes = [8, 8], strides = [1, 1]} : vector<8x96xf32> to vector<8x8xf32>
    %210 = vector.extract_strided_slice %159 {offsets = [0, 48], sizes = [8, 8], strides = [1, 1]} : vector<8x96xf32> to vector<8x8xf32>
    %211 = vector.extract_strided_slice %159 {offsets = [0, 80], sizes = [8, 8], strides = [1, 1]} : vector<8x96xf32> to vector<8x8xf32>
    %212 = arith.truncf %209 : vector<8x8xf32> to vector<8x8xbf16>
    %213 = arith.truncf %210 : vector<8x8xf32> to vector<8x8xbf16>
    %cst_90 = arith.constant dense<0.000000e+00> : vector<8x8xf32>
    %214 = tpu.matmul %212, %213, %cst_90 {dimension_numbers = #tpu.dot_dimension_numbers<[1], [1], [0], [0], [0, 0, 1, 0], [], []>} : vector<8x8xbf16>, vector<8x8xbf16>, vector<8x8xf32> -> vector<8x8xf32>
    %cst_91 = arith.constant dense<0xFF800000> : vector<8xf32>
    %215 = vector.multi_reduction <maximumf>, %214, %cst_91 [1] : vector<8x8xf32> to vector<8xf32>
    %216 = vector.shape_cast %215 : vector<8xf32> to vector<8x1xf32>
    %217 = vector.broadcast %216 : vector<8x1xf32> to vector<8x8xf32>
    %218 = arith.subf %214, %217 : vector<8x8xf32>
    %219 = math.exp %218 : vector<8x8xf32>
    %cst_92 = arith.constant dense<0.000000e+00> : vector<8xf32>
    %220 = vector.multi_reduction <add>, %219, %cst_92 [1] : vector<8x8xf32> to vector<8xf32>
    %221 = vector.shape_cast %220 : vector<8xf32> to vector<8x1xf32>
    %222 = tpu.reciprocal %221 {approx = true} : vector<8x1xf32> -> vector<8x1xf32>
    %223 = vector.broadcast %222 : vector<8x1xf32> to vector<8x8xf32>
    %224 = arith.mulf %219, %223 : vector<8x8xf32>
    %225 = arith.truncf %224 : vector<8x8xf32> to vector<8x8xbf16>
    %226 = arith.truncf %211 : vector<8x8xf32> to vector<8x8xbf16>
    %cst_93 = arith.constant dense<0.000000e+00> : vector<8x8xf32>
    %227 = tpu.matmul %225, %226, %cst_93 {dimension_numbers = #tpu.dot_dimension_numbers<[1], [0], [0], [1], [0, 0, 1, 1], [], []>} : vector<8x8xbf16>, vector<8x8xbf16>, vector<8x8xf32> -> vector<8x8xf32>
    %228 = arith.truncf %227 : vector<8x8xf32> to vector<8x8xbf16>
    %c1_94 = arith.constant 1 : index
    %c2_95 = arith.constant 2 : index
    %c0_96 = arith.constant 0 : index
    %c0_97 = arith.constant 0 : index
    %229 = vector.load %arg4[%c1_94, %c2_95, %c0_96, %c0_97] : memref<3x4x8x32xbf16, #tpu.memory_space<vmem>>, vector<1x1x8x32xbf16>
    %230 = vector.shape_cast %229 : vector<1x1x8x32xbf16> to vector<8x32xbf16>
    %cst_98 = arith.constant dense<0.000000e+00> : vector<8x32xf32>
    %231 = tpu.matmul %228, %230, %cst_98 {dimension_numbers = #tpu.dot_dimension_numbers<[1], [0], [0], [1], [0, 0, 1, 1], [], []>} : vector<8x8xbf16>, vector<8x32xbf16>, vector<8x32xf32> -> vector<8x32xf32>
    %232 = arith.addf %208, %231 : vector<8x32xf32>
    %233 = vector.extract_strided_slice %159 {offsets = [0, 24], sizes = [8, 8], strides = [1, 1]} : vector<8x96xf32> to vector<8x8xf32>
    %234 = vector.extract_strided_slice %159 {offsets = [0, 56], sizes = [8, 8], strides = [1, 1]} : vector<8x96xf32> to vector<8x8xf32>
    %235 = vector.extract_strided_slice %159 {offsets = [0, 88], sizes = [8, 8], strides = [1, 1]} : vector<8x96xf32> to vector<8x8xf32>
    %236 = arith.truncf %233 : vector<8x8xf32> to vector<8x8xbf16>
    %237 = arith.truncf %234 : vector<8x8xf32> to vector<8x8xbf16>
    %cst_99 = arith.constant dense<0.000000e+00> : vector<8x8xf32>
    %238 = tpu.matmul %236, %237, %cst_99 {dimension_numbers = #tpu.dot_dimension_numbers<[1], [1], [0], [0], [0, 0, 1, 0], [], []>} : vector<8x8xbf16>, vector<8x8xbf16>, vector<8x8xf32> -> vector<8x8xf32>
    %cst_100 = arith.constant dense<0xFF800000> : vector<8xf32>
    %239 = vector.multi_reduction <maximumf>, %238, %cst_100 [1] : vector<8x8xf32> to vector<8xf32>
    %240 = vector.shape_cast %239 : vector<8xf32> to vector<8x1xf32>
    %241 = vector.broadcast %240 : vector<8x1xf32> to vector<8x8xf32>
    %242 = arith.subf %238, %241 : vector<8x8xf32>
    %243 = math.exp %242 : vector<8x8xf32>
    %cst_101 = arith.constant dense<0.000000e+00> : vector<8xf32>
    %244 = vector.multi_reduction <add>, %243, %cst_101 [1] : vector<8x8xf32> to vector<8xf32>
    %245 = vector.shape_cast %244 : vector<8xf32> to vector<8x1xf32>
    %246 = tpu.reciprocal %245 {approx = true} : vector<8x1xf32> -> vector<8x1xf32>
    %247 = vector.broadcast %246 : vector<8x1xf32> to vector<8x8xf32>
    %248 = arith.mulf %243, %247 : vector<8x8xf32>
    %249 = arith.truncf %248 : vector<8x8xf32> to vector<8x8xbf16>
    %250 = arith.truncf %235 : vector<8x8xf32> to vector<8x8xbf16>
    %cst_102 = arith.constant dense<0.000000e+00> : vector<8x8xf32>
    %251 = tpu.matmul %249, %250, %cst_102 {dimension_numbers = #tpu.dot_dimension_numbers<[1], [0], [0], [1], [0, 0, 1, 1], [], []>} : vector<8x8xbf16>, vector<8x8xbf16>, vector<8x8xf32> -> vector<8x8xf32>
    %252 = arith.truncf %251 : vector<8x8xf32> to vector<8x8xbf16>
    %c1_103 = arith.constant 1 : index
    %c3_104 = arith.constant 3 : index
    %c0_105 = arith.constant 0 : index
    %c0_106 = arith.constant 0 : index
    %253 = vector.load %arg4[%c1_103, %c3_104, %c0_105, %c0_106] : memref<3x4x8x32xbf16, #tpu.memory_space<vmem>>, vector<1x1x8x32xbf16>
    %254 = vector.shape_cast %253 : vector<1x1x8x32xbf16> to vector<8x32xbf16>
    %cst_107 = arith.constant dense<0.000000e+00> : vector<8x32xf32>
    %255 = tpu.matmul %252, %254, %cst_107 {dimension_numbers = #tpu.dot_dimension_numbers<[1], [0], [0], [1], [0, 0, 1, 1], [], []>} : vector<8x8xbf16>, vector<8x32xbf16>, vector<8x32xf32> -> vector<8x32xf32>
    %256 = arith.addf %232, %255 : vector<8x32xf32>
    %257 = arith.addf %151, %256 : vector<8x32xf32>
    %c1_108 = arith.constant 1 : index
    %c0_109 = arith.constant 0 : index
    %c0_110 = arith.constant 0 : index
    %258 = vector.load %arg5[%c1_108, %c0_109, %c0_110] : memref<3x1x32xf32, #tpu.memory_space<vmem>>, vector<1x1x32xf32>
    %259 = vector.shape_cast %258 : vector<1x1x32xf32> to vector<1x32xf32>
    %260 = vector.broadcast %259 : vector<1x32xf32> to vector<8x32xf32>
    %261 = arith.addf %257, %260 : vector<8x32xf32>
    %cst_111 = arith.constant dense<0.000000e+00> : vector<8xf32>
    %262 = vector.multi_reduction <add>, %261, %cst_111 [1] : vector<8x32xf32> to vector<8xf32>
    %263 = vector.shape_cast %262 : vector<8xf32> to vector<8x1xf32>
    %cst_112 = arith.constant 3.125000e-02 : f32
    %264 = vector.broadcast %cst_112 : f32 to vector<8x1xf32>
    %265 = arith.mulf %263, %264 : vector<8x1xf32>
    %266 = arith.mulf %261, %261 : vector<8x32xf32>
    %cst_113 = arith.constant dense<0.000000e+00> : vector<8xf32>
    %267 = vector.multi_reduction <add>, %266, %cst_113 [1] : vector<8x32xf32> to vector<8xf32>
    %268 = vector.shape_cast %267 : vector<8xf32> to vector<8x1xf32>
    %cst_114 = arith.constant 3.125000e-02 : f32
    %269 = vector.broadcast %cst_114 : f32 to vector<8x1xf32>
    %270 = arith.mulf %268, %269 : vector<8x1xf32>
    %271 = arith.mulf %265, %265 : vector<8x1xf32>
    %272 = arith.subf %270, %271 : vector<8x1xf32>
    %cst_115 = arith.constant 9.99999974E-6 : f32
    %273 = vector.broadcast %cst_115 : f32 to vector<8x1xf32>
    %274 = arith.addf %272, %273 : vector<8x1xf32>
    %275 = math.rsqrt %274 : vector<8x1xf32>
    %276 = vector.broadcast %265 : vector<8x1xf32> to vector<8x32xf32>
    %277 = arith.subf %261, %276 : vector<8x32xf32>
    %278 = vector.broadcast %275 : vector<8x1xf32> to vector<8x32xf32>
    %279 = arith.mulf %277, %278 : vector<8x32xf32>
    %c1_116 = arith.constant 1 : index
    %c0_117 = arith.constant 0 : index
    %c0_118 = arith.constant 0 : index
    %280 = vector.load %arg6[%c1_116, %c0_117, %c0_118] : memref<3x1x32xf32, #tpu.memory_space<vmem>>, vector<1x1x32xf32>
    %281 = vector.shape_cast %280 : vector<1x1x32xf32> to vector<1x32xf32>
    %282 = vector.broadcast %281 : vector<1x32xf32> to vector<8x32xf32>
    %283 = arith.mulf %279, %282 : vector<8x32xf32>
    %c1_119 = arith.constant 1 : index
    %c0_120 = arith.constant 0 : index
    %c0_121 = arith.constant 0 : index
    %284 = vector.load %arg7[%c1_119, %c0_120, %c0_121] : memref<3x1x32xf32, #tpu.memory_space<vmem>>, vector<1x1x32xf32>
    %285 = vector.shape_cast %284 : vector<1x1x32xf32> to vector<1x32xf32>
    %286 = vector.broadcast %285 : vector<1x32xf32> to vector<8x32xf32>
    %287 = arith.addf %283, %286 : vector<8x32xf32>
    %cst_122 = arith.constant 0.000000e+00 : f32
    %288 = vector.broadcast %cst_122 : f32 to vector<1x32xf32>
    %289 = vector.extract_strided_slice %287 {offsets = [0, 0], sizes = [7, 32], strides = [1, 1]} : vector<8x32xf32> to vector<7x32xf32>
    %290 = tpu.concatenate %288, %289 in 0 : vector<1x32xf32>, vector<7x32xf32> -> vector<8x32xf32>
    %291 = vector.extract_strided_slice %287 {offsets = [1, 0], sizes = [7, 32], strides = [1, 1]} : vector<8x32xf32> to vector<7x32xf32>
    %292 = tpu.concatenate %291, %288 in 0 : vector<7x32xf32>, vector<1x32xf32> -> vector<8x32xf32>
    %293 = tpu.concatenate %290, %287, %292 in 1 : vector<8x32xf32>, vector<8x32xf32>, vector<8x32xf32> -> vector<8x96xf32>
    %294 = arith.truncf %293 : vector<8x96xf32> to vector<8x96xbf16>
    %c1_123 = arith.constant 1 : index
    %c0_124 = arith.constant 0 : index
    %c0_125 = arith.constant 0 : index
    %295 = vector.load %arg8[%c1_123, %c0_124, %c0_125] : memref<2x96x32xbf16, #tpu.memory_space<vmem>>, vector<1x96x32xbf16>
    %296 = vector.shape_cast %295 : vector<1x96x32xbf16> to vector<96x32xbf16>
    %cst_126 = arith.constant dense<0.000000e+00> : vector<8x32xf32>
    %297 = tpu.matmul %294, %296, %cst_126 {dimension_numbers = #tpu.dot_dimension_numbers<[1], [0], [0], [1], [0, 0, 1, 1], [], []>} : vector<8x96xbf16>, vector<96x32xbf16>, vector<8x32xf32> -> vector<8x32xf32>
    %c1_127 = arith.constant 1 : index
    %c0_128 = arith.constant 0 : index
    %c0_129 = arith.constant 0 : index
    %298 = vector.load %arg9[%c1_127, %c0_128, %c0_129] : memref<2x1x32xf32, #tpu.memory_space<vmem>>, vector<1x1x32xf32>
    %299 = vector.shape_cast %298 : vector<1x1x32xf32> to vector<1x32xf32>
    %300 = vector.broadcast %299 : vector<1x32xf32> to vector<8x32xf32>
    %301 = arith.addf %297, %300 : vector<8x32xf32>
    %302 = arith.truncf %301 : vector<8x32xf32> to vector<8x32xbf16>
    %c2_130 = arith.constant 2 : index
    %c0_131 = arith.constant 0 : index
    %c0_132 = arith.constant 0 : index
    %303 = vector.load %arg2[%c2_130, %c0_131, %c0_132] : memref<3x32x96xbf16, #tpu.memory_space<vmem>>, vector<1x32x96xbf16>
    %304 = vector.shape_cast %303 : vector<1x32x96xbf16> to vector<32x96xbf16>
    %cst_133 = arith.constant dense<0.000000e+00> : vector<8x96xf32>
    %305 = tpu.matmul %302, %304, %cst_133 {dimension_numbers = #tpu.dot_dimension_numbers<[1], [0], [0], [1], [0, 0, 1, 1], [], []>} : vector<8x32xbf16>, vector<32x96xbf16>, vector<8x96xf32> -> vector<8x96xf32>
    %c2_134 = arith.constant 2 : index
    %c0_135 = arith.constant 0 : index
    %c0_136 = arith.constant 0 : index
    %306 = vector.load %arg3[%c2_134, %c0_135, %c0_136] : memref<3x1x96xf32, #tpu.memory_space<vmem>>, vector<1x1x96xf32>
    %307 = vector.shape_cast %306 : vector<1x1x96xf32> to vector<1x96xf32>
    %308 = vector.broadcast %307 : vector<1x96xf32> to vector<8x96xf32>
    %309 = arith.addf %305, %308 : vector<8x96xf32>
    %cst_137 = arith.constant 0.000000e+00 : f32
    %310 = vector.broadcast %cst_137 : f32 to vector<8x32xf32>
    %311 = vector.extract_strided_slice %309 {offsets = [0, 0], sizes = [8, 8], strides = [1, 1]} : vector<8x96xf32> to vector<8x8xf32>
    %312 = vector.extract_strided_slice %309 {offsets = [0, 32], sizes = [8, 8], strides = [1, 1]} : vector<8x96xf32> to vector<8x8xf32>
    %313 = vector.extract_strided_slice %309 {offsets = [0, 64], sizes = [8, 8], strides = [1, 1]} : vector<8x96xf32> to vector<8x8xf32>
    %314 = arith.truncf %311 : vector<8x8xf32> to vector<8x8xbf16>
    %315 = arith.truncf %312 : vector<8x8xf32> to vector<8x8xbf16>
    %cst_138 = arith.constant dense<0.000000e+00> : vector<8x8xf32>
    %316 = tpu.matmul %314, %315, %cst_138 {dimension_numbers = #tpu.dot_dimension_numbers<[1], [1], [0], [0], [0, 0, 1, 0], [], []>} : vector<8x8xbf16>, vector<8x8xbf16>, vector<8x8xf32> -> vector<8x8xf32>
    %cst_139 = arith.constant dense<0xFF800000> : vector<8xf32>
    %317 = vector.multi_reduction <maximumf>, %316, %cst_139 [1] : vector<8x8xf32> to vector<8xf32>
    %318 = vector.shape_cast %317 : vector<8xf32> to vector<8x1xf32>
    %319 = vector.broadcast %318 : vector<8x1xf32> to vector<8x8xf32>
    %320 = arith.subf %316, %319 : vector<8x8xf32>
    %321 = math.exp %320 : vector<8x8xf32>
    %cst_140 = arith.constant dense<0.000000e+00> : vector<8xf32>
    %322 = vector.multi_reduction <add>, %321, %cst_140 [1] : vector<8x8xf32> to vector<8xf32>
    %323 = vector.shape_cast %322 : vector<8xf32> to vector<8x1xf32>
    %324 = tpu.reciprocal %323 {approx = true} : vector<8x1xf32> -> vector<8x1xf32>
    %325 = vector.broadcast %324 : vector<8x1xf32> to vector<8x8xf32>
    %326 = arith.mulf %321, %325 : vector<8x8xf32>
    %327 = arith.truncf %326 : vector<8x8xf32> to vector<8x8xbf16>
    %328 = arith.truncf %313 : vector<8x8xf32> to vector<8x8xbf16>
    %cst_141 = arith.constant dense<0.000000e+00> : vector<8x8xf32>
    %329 = tpu.matmul %327, %328, %cst_141 {dimension_numbers = #tpu.dot_dimension_numbers<[1], [0], [0], [1], [0, 0, 1, 1], [], []>} : vector<8x8xbf16>, vector<8x8xbf16>, vector<8x8xf32> -> vector<8x8xf32>
    %330 = arith.truncf %329 : vector<8x8xf32> to vector<8x8xbf16>
    %c2_142 = arith.constant 2 : index
    %c0_143 = arith.constant 0 : index
    %c0_144 = arith.constant 0 : index
    %c0_145 = arith.constant 0 : index
    %331 = vector.load %arg4[%c2_142, %c0_143, %c0_144, %c0_145] : memref<3x4x8x32xbf16, #tpu.memory_space<vmem>>, vector<1x1x8x32xbf16>
    %332 = vector.shape_cast %331 : vector<1x1x8x32xbf16> to vector<8x32xbf16>
    %cst_146 = arith.constant dense<0.000000e+00> : vector<8x32xf32>
    %333 = tpu.matmul %330, %332, %cst_146 {dimension_numbers = #tpu.dot_dimension_numbers<[1], [0], [0], [1], [0, 0, 1, 1], [], []>} : vector<8x8xbf16>, vector<8x32xbf16>, vector<8x32xf32> -> vector<8x32xf32>
    %334 = arith.addf %310, %333 : vector<8x32xf32>
    %335 = vector.extract_strided_slice %309 {offsets = [0, 8], sizes = [8, 8], strides = [1, 1]} : vector<8x96xf32> to vector<8x8xf32>
    %336 = vector.extract_strided_slice %309 {offsets = [0, 40], sizes = [8, 8], strides = [1, 1]} : vector<8x96xf32> to vector<8x8xf32>
    %337 = vector.extract_strided_slice %309 {offsets = [0, 72], sizes = [8, 8], strides = [1, 1]} : vector<8x96xf32> to vector<8x8xf32>
    %338 = arith.truncf %335 : vector<8x8xf32> to vector<8x8xbf16>
    %339 = arith.truncf %336 : vector<8x8xf32> to vector<8x8xbf16>
    %cst_147 = arith.constant dense<0.000000e+00> : vector<8x8xf32>
    %340 = tpu.matmul %338, %339, %cst_147 {dimension_numbers = #tpu.dot_dimension_numbers<[1], [1], [0], [0], [0, 0, 1, 0], [], []>} : vector<8x8xbf16>, vector<8x8xbf16>, vector<8x8xf32> -> vector<8x8xf32>
    %cst_148 = arith.constant dense<0xFF800000> : vector<8xf32>
    %341 = vector.multi_reduction <maximumf>, %340, %cst_148 [1] : vector<8x8xf32> to vector<8xf32>
    %342 = vector.shape_cast %341 : vector<8xf32> to vector<8x1xf32>
    %343 = vector.broadcast %342 : vector<8x1xf32> to vector<8x8xf32>
    %344 = arith.subf %340, %343 : vector<8x8xf32>
    %345 = math.exp %344 : vector<8x8xf32>
    %cst_149 = arith.constant dense<0.000000e+00> : vector<8xf32>
    %346 = vector.multi_reduction <add>, %345, %cst_149 [1] : vector<8x8xf32> to vector<8xf32>
    %347 = vector.shape_cast %346 : vector<8xf32> to vector<8x1xf32>
    %348 = tpu.reciprocal %347 {approx = true} : vector<8x1xf32> -> vector<8x1xf32>
    %349 = vector.broadcast %348 : vector<8x1xf32> to vector<8x8xf32>
    %350 = arith.mulf %345, %349 : vector<8x8xf32>
    %351 = arith.truncf %350 : vector<8x8xf32> to vector<8x8xbf16>
    %352 = arith.truncf %337 : vector<8x8xf32> to vector<8x8xbf16>
    %cst_150 = arith.constant dense<0.000000e+00> : vector<8x8xf32>
    %353 = tpu.matmul %351, %352, %cst_150 {dimension_numbers = #tpu.dot_dimension_numbers<[1], [0], [0], [1], [0, 0, 1, 1], [], []>} : vector<8x8xbf16>, vector<8x8xbf16>, vector<8x8xf32> -> vector<8x8xf32>
    %354 = arith.truncf %353 : vector<8x8xf32> to vector<8x8xbf16>
    %c2_151 = arith.constant 2 : index
    %c1_152 = arith.constant 1 : index
    %c0_153 = arith.constant 0 : index
    %c0_154 = arith.constant 0 : index
    %355 = vector.load %arg4[%c2_151, %c1_152, %c0_153, %c0_154] : memref<3x4x8x32xbf16, #tpu.memory_space<vmem>>, vector<1x1x8x32xbf16>
    %356 = vector.shape_cast %355 : vector<1x1x8x32xbf16> to vector<8x32xbf16>
    %cst_155 = arith.constant dense<0.000000e+00> : vector<8x32xf32>
    %357 = tpu.matmul %354, %356, %cst_155 {dimension_numbers = #tpu.dot_dimension_numbers<[1], [0], [0], [1], [0, 0, 1, 1], [], []>} : vector<8x8xbf16>, vector<8x32xbf16>, vector<8x32xf32> -> vector<8x32xf32>
    %358 = arith.addf %334, %357 : vector<8x32xf32>
    %359 = vector.extract_strided_slice %309 {offsets = [0, 16], sizes = [8, 8], strides = [1, 1]} : vector<8x96xf32> to vector<8x8xf32>
    %360 = vector.extract_strided_slice %309 {offsets = [0, 48], sizes = [8, 8], strides = [1, 1]} : vector<8x96xf32> to vector<8x8xf32>
    %361 = vector.extract_strided_slice %309 {offsets = [0, 80], sizes = [8, 8], strides = [1, 1]} : vector<8x96xf32> to vector<8x8xf32>
    %362 = arith.truncf %359 : vector<8x8xf32> to vector<8x8xbf16>
    %363 = arith.truncf %360 : vector<8x8xf32> to vector<8x8xbf16>
    %cst_156 = arith.constant dense<0.000000e+00> : vector<8x8xf32>
    %364 = tpu.matmul %362, %363, %cst_156 {dimension_numbers = #tpu.dot_dimension_numbers<[1], [1], [0], [0], [0, 0, 1, 0], [], []>} : vector<8x8xbf16>, vector<8x8xbf16>, vector<8x8xf32> -> vector<8x8xf32>
    %cst_157 = arith.constant dense<0xFF800000> : vector<8xf32>
    %365 = vector.multi_reduction <maximumf>, %364, %cst_157 [1] : vector<8x8xf32> to vector<8xf32>
    %366 = vector.shape_cast %365 : vector<8xf32> to vector<8x1xf32>
    %367 = vector.broadcast %366 : vector<8x1xf32> to vector<8x8xf32>
    %368 = arith.subf %364, %367 : vector<8x8xf32>
    %369 = math.exp %368 : vector<8x8xf32>
    %cst_158 = arith.constant dense<0.000000e+00> : vector<8xf32>
    %370 = vector.multi_reduction <add>, %369, %cst_158 [1] : vector<8x8xf32> to vector<8xf32>
    %371 = vector.shape_cast %370 : vector<8xf32> to vector<8x1xf32>
    %372 = tpu.reciprocal %371 {approx = true} : vector<8x1xf32> -> vector<8x1xf32>
    %373 = vector.broadcast %372 : vector<8x1xf32> to vector<8x8xf32>
    %374 = arith.mulf %369, %373 : vector<8x8xf32>
    %375 = arith.truncf %374 : vector<8x8xf32> to vector<8x8xbf16>
    %376 = arith.truncf %361 : vector<8x8xf32> to vector<8x8xbf16>
    %cst_159 = arith.constant dense<0.000000e+00> : vector<8x8xf32>
    %377 = tpu.matmul %375, %376, %cst_159 {dimension_numbers = #tpu.dot_dimension_numbers<[1], [0], [0], [1], [0, 0, 1, 1], [], []>} : vector<8x8xbf16>, vector<8x8xbf16>, vector<8x8xf32> -> vector<8x8xf32>
    %378 = arith.truncf %377 : vector<8x8xf32> to vector<8x8xbf16>
    %c2_160 = arith.constant 2 : index
    %c2_161 = arith.constant 2 : index
    %c0_162 = arith.constant 0 : index
    %c0_163 = arith.constant 0 : index
    %379 = vector.load %arg4[%c2_160, %c2_161, %c0_162, %c0_163] : memref<3x4x8x32xbf16, #tpu.memory_space<vmem>>, vector<1x1x8x32xbf16>
    %380 = vector.shape_cast %379 : vector<1x1x8x32xbf16> to vector<8x32xbf16>
    %cst_164 = arith.constant dense<0.000000e+00> : vector<8x32xf32>
    %381 = tpu.matmul %378, %380, %cst_164 {dimension_numbers = #tpu.dot_dimension_numbers<[1], [0], [0], [1], [0, 0, 1, 1], [], []>} : vector<8x8xbf16>, vector<8x32xbf16>, vector<8x32xf32> -> vector<8x32xf32>
    %382 = arith.addf %358, %381 : vector<8x32xf32>
    %383 = vector.extract_strided_slice %309 {offsets = [0, 24], sizes = [8, 8], strides = [1, 1]} : vector<8x96xf32> to vector<8x8xf32>
    %384 = vector.extract_strided_slice %309 {offsets = [0, 56], sizes = [8, 8], strides = [1, 1]} : vector<8x96xf32> to vector<8x8xf32>
    %385 = vector.extract_strided_slice %309 {offsets = [0, 88], sizes = [8, 8], strides = [1, 1]} : vector<8x96xf32> to vector<8x8xf32>
    %386 = arith.truncf %383 : vector<8x8xf32> to vector<8x8xbf16>
    %387 = arith.truncf %384 : vector<8x8xf32> to vector<8x8xbf16>
    %cst_165 = arith.constant dense<0.000000e+00> : vector<8x8xf32>
    %388 = tpu.matmul %386, %387, %cst_165 {dimension_numbers = #tpu.dot_dimension_numbers<[1], [1], [0], [0], [0, 0, 1, 0], [], []>} : vector<8x8xbf16>, vector<8x8xbf16>, vector<8x8xf32> -> vector<8x8xf32>
    %cst_166 = arith.constant dense<0xFF800000> : vector<8xf32>
    %389 = vector.multi_reduction <maximumf>, %388, %cst_166 [1] : vector<8x8xf32> to vector<8xf32>
    %390 = vector.shape_cast %389 : vector<8xf32> to vector<8x1xf32>
    %391 = vector.broadcast %390 : vector<8x1xf32> to vector<8x8xf32>
    %392 = arith.subf %388, %391 : vector<8x8xf32>
    %393 = math.exp %392 : vector<8x8xf32>
    %cst_167 = arith.constant dense<0.000000e+00> : vector<8xf32>
    %394 = vector.multi_reduction <add>, %393, %cst_167 [1] : vector<8x8xf32> to vector<8xf32>
    %395 = vector.shape_cast %394 : vector<8xf32> to vector<8x1xf32>
    %396 = tpu.reciprocal %395 {approx = true} : vector<8x1xf32> -> vector<8x1xf32>
    %397 = vector.broadcast %396 : vector<8x1xf32> to vector<8x8xf32>
    %398 = arith.mulf %393, %397 : vector<8x8xf32>
    %399 = arith.truncf %398 : vector<8x8xf32> to vector<8x8xbf16>
    %400 = arith.truncf %385 : vector<8x8xf32> to vector<8x8xbf16>
    %cst_168 = arith.constant dense<0.000000e+00> : vector<8x8xf32>
    %401 = tpu.matmul %399, %400, %cst_168 {dimension_numbers = #tpu.dot_dimension_numbers<[1], [0], [0], [1], [0, 0, 1, 1], [], []>} : vector<8x8xbf16>, vector<8x8xbf16>, vector<8x8xf32> -> vector<8x8xf32>
    %402 = arith.truncf %401 : vector<8x8xf32> to vector<8x8xbf16>
    %c2_169 = arith.constant 2 : index
    %c3_170 = arith.constant 3 : index
    %c0_171 = arith.constant 0 : index
    %c0_172 = arith.constant 0 : index
    %403 = vector.load %arg4[%c2_169, %c3_170, %c0_171, %c0_172] : memref<3x4x8x32xbf16, #tpu.memory_space<vmem>>, vector<1x1x8x32xbf16>
    %404 = vector.shape_cast %403 : vector<1x1x8x32xbf16> to vector<8x32xbf16>
    %cst_173 = arith.constant dense<0.000000e+00> : vector<8x32xf32>
    %405 = tpu.matmul %402, %404, %cst_173 {dimension_numbers = #tpu.dot_dimension_numbers<[1], [0], [0], [1], [0, 0, 1, 1], [], []>} : vector<8x8xbf16>, vector<8x32xbf16>, vector<8x32xf32> -> vector<8x32xf32>
    %406 = arith.addf %382, %405 : vector<8x32xf32>
    %407 = arith.addf %301, %406 : vector<8x32xf32>
    %c2_174 = arith.constant 2 : index
    %c0_175 = arith.constant 0 : index
    %c0_176 = arith.constant 0 : index
    %408 = vector.load %arg5[%c2_174, %c0_175, %c0_176] : memref<3x1x32xf32, #tpu.memory_space<vmem>>, vector<1x1x32xf32>
    %409 = vector.shape_cast %408 : vector<1x1x32xf32> to vector<1x32xf32>
    %410 = vector.broadcast %409 : vector<1x32xf32> to vector<8x32xf32>
    %411 = arith.addf %407, %410 : vector<8x32xf32>
    %cst_177 = arith.constant dense<0.000000e+00> : vector<8xf32>
    %412 = vector.multi_reduction <add>, %411, %cst_177 [1] : vector<8x32xf32> to vector<8xf32>
    %413 = vector.shape_cast %412 : vector<8xf32> to vector<8x1xf32>
    %cst_178 = arith.constant 3.125000e-02 : f32
    %414 = vector.broadcast %cst_178 : f32 to vector<8x1xf32>
    %415 = arith.mulf %413, %414 : vector<8x1xf32>
    %416 = arith.mulf %411, %411 : vector<8x32xf32>
    %cst_179 = arith.constant dense<0.000000e+00> : vector<8xf32>
    %417 = vector.multi_reduction <add>, %416, %cst_179 [1] : vector<8x32xf32> to vector<8xf32>
    %418 = vector.shape_cast %417 : vector<8xf32> to vector<8x1xf32>
    %cst_180 = arith.constant 3.125000e-02 : f32
    %419 = vector.broadcast %cst_180 : f32 to vector<8x1xf32>
    %420 = arith.mulf %418, %419 : vector<8x1xf32>
    %421 = arith.mulf %415, %415 : vector<8x1xf32>
    %422 = arith.subf %420, %421 : vector<8x1xf32>
    %cst_181 = arith.constant 9.99999974E-6 : f32
    %423 = vector.broadcast %cst_181 : f32 to vector<8x1xf32>
    %424 = arith.addf %422, %423 : vector<8x1xf32>
    %425 = math.rsqrt %424 : vector<8x1xf32>
    %426 = vector.broadcast %415 : vector<8x1xf32> to vector<8x32xf32>
    %427 = arith.subf %411, %426 : vector<8x32xf32>
    %428 = vector.broadcast %425 : vector<8x1xf32> to vector<8x32xf32>
    %429 = arith.mulf %427, %428 : vector<8x32xf32>
    %c2_182 = arith.constant 2 : index
    %c0_183 = arith.constant 0 : index
    %c0_184 = arith.constant 0 : index
    %430 = vector.load %arg6[%c2_182, %c0_183, %c0_184] : memref<3x1x32xf32, #tpu.memory_space<vmem>>, vector<1x1x32xf32>
    %431 = vector.shape_cast %430 : vector<1x1x32xf32> to vector<1x32xf32>
    %432 = vector.broadcast %431 : vector<1x32xf32> to vector<8x32xf32>
    %433 = arith.mulf %429, %432 : vector<8x32xf32>
    %c2_185 = arith.constant 2 : index
    %c0_186 = arith.constant 0 : index
    %c0_187 = arith.constant 0 : index
    %434 = vector.load %arg7[%c2_185, %c0_186, %c0_187] : memref<3x1x32xf32, #tpu.memory_space<vmem>>, vector<1x1x32xf32>
    %435 = vector.shape_cast %434 : vector<1x1x32xf32> to vector<1x32xf32>
    %436 = vector.broadcast %435 : vector<1x32xf32> to vector<8x32xf32>
    %437 = arith.addf %433, %436 : vector<8x32xf32>
    %c0_188 = arith.constant 0 : index
    %c0_189 = arith.constant 0 : index
    %c0_190 = arith.constant 0 : index
    %438 = vector.load %arg10[%c0_188, %c0_189, %c0_190] : memref<1x8x32xf32, #tpu.memory_space<vmem>>, vector<1x8x32xf32>
    %439 = vector.shape_cast %438 : vector<1x8x32xf32> to vector<8x32xf32>
    %440 = vector.shape_cast %437 : vector<8x32xf32> to vector<1x8x32xf32>
    tpu.vector_store %arg10[%c0_188, %c0_189, %c0_190], %440 {strides = array<i32>} : memref<1x8x32xf32, #tpu.memory_space<vmem>>, vector<1x8x32xf32>,
    return
  }
  func.func @transform_0(%arg0: i32) -> (i32, i32, i32) {
    %c0_i32 = arith.constant 0 : i32
    %c0_i32_0 = arith.constant 0 : i32
    %c0_i32_1 = arith.constant 0 : i32
    return %arg0, %c0_i32, %c0_i32_0 : i32, i32, i32
  }
  func.func @transform_1(%arg0: i32) -> (i32, i32, i32) {
    %c0_i32 = arith.constant 0 : i32
    %c0_i32_0 = arith.constant 0 : i32
    %c0_i32_1 = arith.constant 0 : i32
    %c0_i32_2 = arith.constant 0 : i32
    return %c0_i32, %c0_i32_0, %c0_i32_1 : i32, i32, i32
  }
  func.func @transform_2(%arg0: i32) -> (i32, i32, i32) {
    %c0_i32 = arith.constant 0 : i32
    %c0_i32_0 = arith.constant 0 : i32
    %c0_i32_1 = arith.constant 0 : i32
    %c0_i32_2 = arith.constant 0 : i32
    return %c0_i32, %c0_i32_0, %c0_i32_1 : i32, i32, i32
  }
  func.func @transform_3(%arg0: i32) -> (i32, i32, i32, i32) {
    %c0_i32 = arith.constant 0 : i32
    %c0_i32_0 = arith.constant 0 : i32
    %c0_i32_1 = arith.constant 0 : i32
    %c0_i32_2 = arith.constant 0 : i32
    %c0_i32_3 = arith.constant 0 : i32
    return %c0_i32, %c0_i32_0, %c0_i32_1, %c0_i32_2 : i32, i32, i32, i32
  }
  func.func @transform_4(%arg0: i32) -> (i32, i32, i32) {
    %c0_i32 = arith.constant 0 : i32
    %c0_i32_0 = arith.constant 0 : i32
    %c0_i32_1 = arith.constant 0 : i32
    %c0_i32_2 = arith.constant 0 : i32
    return %c0_i32, %c0_i32_0, %c0_i32_1 : i32, i32, i32
  }
  func.func @transform_5(%arg0: i32) -> (i32, i32, i32) {
    %c0_i32 = arith.constant 0 : i32
    %c0_i32_0 = arith.constant 0 : i32
    %c0_i32_1 = arith.constant 0 : i32
    %c0_i32_2 = arith.constant 0 : i32
    return %c0_i32, %c0_i32_0, %c0_i32_1 : i32, i32, i32
  }
  func.func @transform_6(%arg0: i32) -> (i32, i32, i32) {
    %c0_i32 = arith.constant 0 : i32
    %c0_i32_0 = arith.constant 0 : i32
    %c0_i32_1 = arith.constant 0 : i32
    %c0_i32_2 = arith.constant 0 : i32
    return %c0_i32, %c0_i32_0, %c0_i32_1 : i32, i32, i32
  }
  func.func @transform_7(%arg0: i32) -> (i32, i32, i32) {
    %c0_i32 = arith.constant 0 : i32
    %c0_i32_0 = arith.constant 0 : i32
    %c0_i32_1 = arith.constant 0 : i32
    %c0_i32_2 = arith.constant 0 : i32
    return %c0_i32, %c0_i32_0, %c0_i32_1 : i32, i32, i32
  }
  func.func @transform_8(%arg0: i32) -> (i32, i32, i32) {
    %c0_i32 = arith.constant 0 : i32
    %c0_i32_0 = arith.constant 0 : i32
    %c0_i32_1 = arith.constant 0 : i32
    %c0_i32_2 = arith.constant 0 : i32
    return %c0_i32, %c0_i32_0, %c0_i32_1 : i32, i32, i32
  }
  func.func @transform_9(%arg0: i32) -> (i32, i32, i32) {
    %c0_i32 = arith.constant 0 : i32
    %c0_i32_0 = arith.constant 0 : i32
    %c0_i32_1 = arith.constant 0 : i32
    return %arg0, %c0_i32, %c0_i32_0 : i32, i32, i32
  }
}

</mosaic_0001>

<bundles_post_ra>
// kernel: tpu_custom_call.1
= control target key start
LH: loop header
LB: loop body
LE: loop exit
PB: predicated region body
PF: predicated region fallthrough
CT: control target
= control target key end

     0   :  { %s2630_s0 = inlined_call_operand.vmem [shape: f32[2,8,32], index: 0, kind: input, shape index: {}]   ;;  %s2631_s1 = inlined_call_operand.vmem [shape: bf16[3,32,96], index: 1, kind: input, shape index: {}]   ;;  %s2632_s2 = inlined_call_operand.vmem [shape: f32[3,1,96], index: 2, kind: input, shape index: {}]   ;;  %s2633_s3 = inlined_call_operand.vmem [shape: bf16[3,4,8,32], index: 3, kind: input, shape index: {}]   ;;  %s2634_s4 = inlined_call_operand.vmem [shape: f32[3,1,32], index: 4, kind: input, shape index: {}]   ;;  %s2635_s5 = inlined_call_operand.vmem [shape: f32[3,1,32], index: 5, kind: input, shape index: {}]   ;;  %s2636_s6 = inlined_call_operand.vmem [shape: f32[3,1,32], index: 6, kind: input, shape index: {}]   ;;  %s2637_s7 = inlined_call_operand.vmem [shape: bf16[2,96,32], index: 7, kind: input, shape index: {}]   ;;  %s2638_s8 = inlined_call_operand.vmem [shape: f32[2,1,32], index: 8, kind: input, shape index: {}]   ;;  %s2639_s9 = inlined_call_operand.hbm [shape: f32[2,8,32], index: 9, kind: output, shape index: {}]  }
   0x1   :  { %2667 = sst [smem:[#allocation10_spill]] %s2630_s0 }
   0x2   :  { %14 = vsyncpa [#allocation3], 0 }
   0x3   :  { %16 = vsyncpa [#allocation3 + $0x1], 0  ;;  %s2193_s30 = smov 0   ;;  %s2195_s10 = smov 0  }
   0x4   :  { %s2197_s11 = smov 0   ;;  %s2199_s12 = smov 0  }
   0x5 LB: > { %2668 = sst [smem:[#allocation5_spill]] %s2117_s30  ;;  %s2214_s13 = sadd.s32 4294967295, %s2129_s12   ;;  %s2129_s12 = sphi %s2199_s12, %s2690_s12   ;;  %s2125_s11 = sphi %s2197_s11, %s2692_s11   ;;  %s2121_s10 = sphi %s2195_s10, %s2694_s10   ;;  %s2117_s30 = sphi %s2193_s30, %s2693_s30  }
   0x6   : > { %2669 = sst [smem:[#allocation6_spill]] %s2125_s11  ;;  %s1767_s14 = sadd.s32 4294967294, %s2129_s12  }
   0x7   : > { %s2218_s15 = sadd.s32 1, %s2129_s12   ;;  %s223_s16 = sadd.s32 1, %s2125_s11 }
   0x8   : > { %2670 = sst [smem:[#allocation7_spill]] %s2218_s15  ;;  %s220_s17 = ssub.s32 %s2129_s12, %s2218_s15 }
   0x9   : > { %p233_p0 = scmp.ne.s32.totalorder %s2125_s11, %s2121_s10  ;;  %p221_p1 = scmp.eq.s32.totalorder %s220_s17, 0 }
   0xa   : > { %p234_p2 = scmp.eq.s32.totalorder %s2214_s13, 1  ;;  %p239_p3 = scmp.ne.s32.totalorder %s2121_s10, %s2117_s30 }
   0xb   : > { %p240_p4 = scmp.eq.s32.totalorder %s1767_s14, 1  ;;  %p1770_p7 = scmp.ge.s32.totalorder %s2129_s12, 1 }
   0xc   : > { %s2229_s18 = scalar_select %p221_p1, %s2125_s11, %s223_s16  }
   0xd   : > { %p2231_p5 = por %p234_p2, %p233_p0  ;;  %p2235_p6 = por %p240_p4, %p239_p3 }
   0xe   : > { %2671 = sst [smem:[#allocation8_spill]] %s2229_s18  ;;  %p289_p8 = scmp.lt.s32.totalorder %s2129_s12, 3 }
   0xf   : > { %s2673_s20 = scalar_select %p2235_p6, 1, 0 }
  0x10   : > { %p290_p9 = pnand %p1770_p7, %p289_p8 }
  0x11   : > { %2674 = sst [smem:[#allocation9_spill]] %s2673_s20  ;;  %p324_p10 = scmp.lt.s32.totalorder (!%p290_p9), %s2214_s13, 1 }
  0x12   : > { %293 = sbr.rel (%p290_p9) target bundleno = 5284 (0x14a4), region = 56  ;;  %s2675_s0 = sld [smem:[#allocation10_spill]] (!%p290_p9) }
  0x13   : > { %s2657_s17 = smov (!%p290_p9), 88   ;;  %s2659_s21 = smov (!%p290_p9), 96  }
  0x14   : > { %s2655_s22 = smov (!%p290_p9), 120   ;;  %s2646_s23 = smov (!%p290_p9), 80  }
  0x15   : > { %s2648_s24 = smov (!%p290_p9), 72   ;;  %s2644_s28 = smov (!%p290_p9), 56  }
  0x16   : > { %s2660_s14 = smov (!%p290_p9), 64   ;;  %s2653_s16 = smov (!%p290_p9), 104  }
  0x17   : > { %v1931_v0 = vld [vmem:[%s2631_s1 + $0x8] sm:$0xff]  ;;  %v1930_v1 = vld [vmem:[%s2631_s1] sm:$0xff]  ;;  %s325_s25 = scalar_select %p324_p10, %s2214_s13, 1  ;;  %vm351_vm0 = vcmask 261120   ;;  %vm372_vm1 = vcmask 64512   ;;  %vm409_vm2 = vcmask 1043456  }
  0x18   : > { %361 = vmatpush.bf16.msra.mxu0 %v1931_v0  ;;  %v1999_v4 = vld [vmem:[%s2632_s2] ss:$0 sm:$0xff]  ;;  %v1786_v55 = vld [vmem:[%s2633_s3 + $0x4] sm:$0xf]  ;;  %vm730_vm6 = vcmask 1046528   ;;  %vm726_vm7 = vcmask 1040384  }
  0x19   : > { %s1772_s26 = sshll.u32 %s325_s25, 3  ;;  %s2650_s25 = smov 112   ;;  %v427_v14 = vld [vmem:[%s2633_s3] sm:$0xf]  ;;  %v491_v56 = vsel %vm409_vm2, %v1786_v55, 0  ;;  %vm740_vm8 = vcmask 523264  }
  0x1a   : > { %s327_s29 = scalar_lea.vmem %s2675_s0, %s1772_s26  ;;  %v510_v17 = vsel %vm409_vm2, %v427_v14, 0  ;;  %s2642_s26 = smov 48   ;;  %vm795_vm9 = vcmask 785408  }
  0x1b   : > { %v2252_v2 = vld [vmem:[%s327_s29] sm:$0xff]  ;;  %s2640_s29 = smov 40   ;;  %s2679_s27 = smov 112  }
  0x1c   : > { %362 = vmatpush.bf16.msra.mxu0 %v1930_v1  ;;  %v330_v3 = vpack.c.bf16 %v2252_v2, %v2252_v2  ;;  %s2685_s11 = smov 32   ;;  %s2686_s18 = smov 64  }
  0x1d   : > { %s1927_s20 = sshll.u32 %s2214_s13, 3 }
  0x1f   : > { %1781 = vmatmul.msk.bf16.vlgmr.msra.gmra.mxu0 %vm351_vm0, %v330_v3 }
  0x20   : > { %500 = vmatpush.bf16.msrb.mxu0 %v491_v56 }
  0x9c   : > { %v364_v5 = vpop.f32.mrf.mxu0 }
  0x9d   : > { %v365_v6 = vadd.f32 %v1999_v4, %v364_v5 }
  0x9f   : > { %v2260_v7 = vpack.c.bf16 %v365_v6, %v365_v6 }
  0xa1   : > { %430 = vrot.lane.b32.xlu2 %v2260_v7, %s2657_s17  ;;  %370 = vrot.lane.b32.xlu0 %v2260_v7, %s2659_s21  ;;  %s2680_s17 = smov 72  }
  0xa4   : > { %v366_v8 = vpop.f32.mrf.mxu0 }
  0xa9   : > { %428 = vrot.lane.b32.xlu2 %v2260_v7, %s2655_s22  ;;  %s2681_s22 = smov 80  }
  0xb1   : > { %527 = vrot.lane.b32.xlu2 %v2260_v7, %s2646_s23  ;;  %s2652_s23 = smov 32  }
  0xb9   : > { %606 = vrot.lane.b32.xlu2 %v2260_v7, %s2648_s24  ;;  %s2676_s24 = smov 88  }
  0xc1   : > { %525 = vrot.lane.b32.xlu2 %v2260_v7, %s2650_s25  ;;  %s2678_s25 = smov 104  }
  0xfb   : > { %v431_v9 = vpop.permute.xlu2 %430 }
  0xfc   : > { %v436_v10 = vsel %vm372_vm1, %v431_v9, 0 }
  0xfd   : > { %445 = vmatpush.bf16.xpose.msra.mxu3 %v436_v10 }
 0x103   : > { %v429_v11 = vpop.permute.xlu2 %428 }
 0x104   : > { %1784 = vmatmul.msk.bf16.vlgmr.msra.gmra.mxu3 %vm372_vm1, %v429_v11 }
 0x10b   : > { %v528_v12 = vpop.permute.xlu2 %527 }
 0x10c   : > { %v533_v13 = vsel %vm372_vm1, %v528_v12, 0 }
 0x10d   : > { %542 = vmatpush.bf16.xpose.msrb.mxu3 %v533_v13 }
 0x113   : > { %v607_v15 = vpop.permute.xlu2 %606  ;;  %v371_v16 = vpop.permute.xlu0 %370 }
 0x114   : > { %v377_v18 = vsel %vm372_vm1, %v371_v16, 0  ;;  %v612_v20 = vsel %vm372_vm1, %v607_v15, 0 }
 0x115   : > { %386 = vmatpush.bf16.xpose.msra.mxu1 %v377_v18 }
 0x11b   : > { %v526_v19 = vpop.permute.xlu2 %525 }
 0x11c   : > { %1782 = vmatmul.msk.bf16.vlgmr.msra.gmra.mxu1 %vm372_vm1, %v2260_v7  ;;  %1789 = vmatmul.msk.bf16.vlgmr.msrb.gmra.mxu3 %vm372_vm1, %v526_v19 }
 0x11d   : > { %519 = vmatpush.bf16.msrb.mxu1 %v510_v17 }
 0x121   : > { %621 = vmatpush.bf16.xpose.msra.mxu1 %v612_v20 }
 0x187   : > { %v447_v21 = vpop.f32.mrf.mxu3 }
 0x188   : > { %v451_v22 = vsel %vm372_vm1, %v447_v21, -inf }
 0x189   : > { %452 = vmax.xlane.f32.xlu2 %v451_v22 }
 0x18f   : > { %v449_v23 = vpop.f32.mrf.mxu3 }
 0x199   : > { %v388_v24 = vpop.f32.mrf.mxu1 }
 0x19a   : > { %v392_v25 = vsel %vm372_vm1, %v388_v24, -inf }
 0x19b   : > { %393 = vmax.xlane.f32.xlu0 %v392_v25 }
 0x19f   : > { %v2288_v26 = vpop.f32.mrf.mxu3 }
 0x1a0   : > { %v548_v28 = vsel %vm372_vm1, %v2288_v26, -inf }
 0x1a1   : > { %v390_v27 = vpop.f32.mrf.mxu1 }
 0x1a3   : > { %549 = vmax.xlane.f32.xlu0 %v548_v28 }
 0x1a7   : > { %v546_v29 = vpop.f32.mrf.mxu3 }
 0x1fc   : > { %v453_v30 = vpop.xlane.xlu2 %452 }
 0x1fd   : > { %v454_v31 = vsub.f32 %v447_v21, %v453_v30  ;;  %v1791_v30 = vld [vmem:[%s2633_s3 + $0x8] sm:$0xf] }
 0x1ff   : > { %v455_v32 = vmul.f32 1.442695, %v454_v31  ;;  %v588_v31 = vsel %vm409_vm2, %v1791_v30, 0 }
 0x200   : > { %597 = vmatpush.bf16.msra.mxu0 %v588_v31 }
 0x201   : > { %2013 = vpow2.f32 %v455_v32 }
 0x207   : > { %v2014_v33 = vpop.eup %2013 }
 0x208   : > { %v457_v34 = vsel %vm372_vm1, %v2014_v33, 0.0 }
 0x209   : > { %458 = vadd.xlane.f32.xlu0 %v457_v34 }
 0x20e   : > { %v394_v35 = vpop.xlane.xlu0 %393 }
 0x20f   : > { %v395_v36 = vsub.f32 %v388_v24, %v394_v35 }
 0x211   : > { %v396_v37 = vmul.f32 1.442695, %v395_v36 }
 0x213   : > { %2015 = vpow2.f32 %v396_v37 }
 0x216   : > { %v550_v40 = vpop.xlane.xlu0 %549 }
 0x217   : > { %v551_v1 = vsub.f32 %v2288_v26, %v550_v40 }
 0x219   : > { %v2016_v38 = vpop.eup %2015  ;;  %v552_v4 = vmul.f32 1.442695, %v551_v1 }
 0x21a   : > { %v398_v39 = vsel %vm372_vm1, %v2016_v38, 0.0 }
 0x21b   : > { %399 = vadd.xlane.f32.xlu1 %v398_v39 }
 0x21d   : > { %463 = vrot.lane.b32.xlu0 %v2260_v7, %s2644_s28  ;;  %s2682_s28 = smov 56  }
 0x225   : > { %639 = vrot.lane.b32.xlu0 %v2260_v7, %s2640_s29  ;;  %s2683_s29 = smov 48  }
 0x234   : > { %404 = vrot.lane.b32.xlu1 %v2260_v7, %s2660_s14 }
 0x23c   : > { %604 = vrot.lane.b32.xlu1 %v2260_v7, %s2653_s16  ;;  %s2687_s16 = smov 96  }
 0x27c   : > { %v459_v41 = vpop.xlane.xlu0 %458 }
 0x28e   : > { %v400_v45 = vpop.xlane.xlu1 %399 }
 0x28f   : > { %v464_v42 = vpop.permute.xlu0 %463  ;;  %2017 = vrcp.f32 %v400_v45 }
 0x290   : > { %v469_v50 = vsel %vm409_vm2, %v464_v42, 0  ;;  %2019 = vrcp.f32 %v459_v41  ;;  %v2000_v42 = vld [vmem:[%s2634_s4] ss:$0 sm:$0xff] }
 0x291   : > { %2021 = vpow2.f32 %v552_v4 }
 0x295   : > { %v2018_v46 = vpop.eup %2017 }
 0x296   : > { %v402_v47 = vmul.f32 %v2018_v46, %v2016_v38  ;;  %v2020_v52 = vpop.eup %2019 }
 0x297   : > { %v640_v43 = vpop.permute.xlu0 %639  ;;  %v461_v53 = vmul.f32 %v2020_v52, %v2014_v33  ;;  %v2022_v10 = vpop.eup %2021 }
 0x298   : > { %v645_v44 = vsel %vm409_vm2, %v640_v43, 0  ;;  %v403_v51 = vpack.c.bf16 %v402_v47, %v402_v47  ;;  %v554_v13 = vsel %vm372_vm1, %v2022_v10, 0.0 }
 0x299   : > { %654 = vmatpush.bf16.msra.mxu3 %v645_v44  ;;  %v462_v54 = vpack.c.bf16 %v461_v53, %v461_v53 }
 0x2a6   : > { %v405_v48 = vpop.permute.xlu1 %404 }
 0x2a7   : > { %v411_v49 = vsel %vm409_vm2, %v405_v48, 0 }
 0x2a8   : > { %420 = vmatpush.bf16.msra.mxu2 %v411_v49 }
 0x2ab   : > { %1783 = vmatmul.msk.bf16.vlgmr.msra.gmra.mxu2 %vm372_vm1, %v403_v51 }
 0x2ac   : > { %478 = vmatpush.bf16.msrb.mxu2 %v469_v50 }
 0x2ae   : > { %v605_v62 = vpop.permute.xlu1 %604 }
 0x2bb   : > { %1785 = vmatmul.msk.bf16.vlgmr.msrb.gmra.mxu2 %vm372_vm1, %v462_v54 }
 0x32e   : > { %v422_v57 = vpop.f32.mrf.mxu2 }
 0x32f   : > { %v426_v58 = vpack.c.bf16 %v422_v57, %v422_v57 }
 0x331   : > { %1788 = vmatmul.msk.bf16.vlgmr.msrb.gmra.mxu1 %vm372_vm1, %v426_v58 }
 0x336   : > { %v424_v59 = vpop.f32.mrf.mxu2 }
 0x33e   : > { %v480_v60 = vpop.f32.mrf.mxu2 }
 0x33f   : > { %v484_v61 = vpack.c.bf16 %v480_v60, %v480_v60 }
 0x341   : > { %1787 = vmatmul.msk.bf16.vlgmr.msrb.gmra.mxu0 %vm372_vm1, %v484_v61  ;;  %1793 = vmatmul.msk.bf16.vlgmr.msra.gmra.mxu1 %vm372_vm1, %v605_v62 }
 0x346   : > { %v482_v63 = vpop.f32.mrf.mxu2 }
 0x347   : > { %v2001_v63 = vld [vmem:[%s2635_s5] ss:$0 sm:$0xff] }
 0x3ae   : > { %v521_v0 = vpop.f32.mrf.mxu1 }
 0x3b6   : > { %v523_v3 = vpop.f32.mrf.mxu1 }
 0x3b7   : > { %v2002_v3 = vld [vmem:[%s2636_s6] ss:$0 sm:$0xff] }
 0x3be   : > { %v502_v5 = vpop.f32.mrf.mxu0  ;;  %v623_v6 = vpop.f32.mrf.mxu1 }
 0x3bf   : > { %v522_v8 = vadd.f32 %v521_v0, %v502_v5  ;;  %v627_v9 = vsel %vm372_vm1, %v623_v6, -inf }
 0x3c0   : > { %628 = vmax.xlane.f32.xlu1 %v627_v9  ;;  %v1937_v9 = vld [vmem:[%s2637_s7 + $0x28] sm:$0xff] }
 0x3c1   : > { %801 = vmatpush.bf16.msrb.mxu0 %v1937_v9 }
 0x3c6   : > { %v504_v11 = vpop.f32.mrf.mxu0  ;;  %v625_v12 = vpop.f32.mrf.mxu1 }
 0x3c7   : > { %v1935_v11 = vld [vmem:[%s2637_s7 + $0x18] sm:$0xff]  ;;  %v1934_v12 = vld [vmem:[%s2637_s7 + $0x10] sm:$0xff] }
 0x3c8   : > { %555 = vadd.xlane.f32.xlu1 %v554_v13  ;;  %v1933_v13 = vld [vmem:[%s2637_s7 + $0x8] sm:$0xff] }
 0x433   : > { %v629_v14 = vpop.xlane.xlu1 %628 }
 0x434   : > { %v630_v15 = vsub.f32 %v623_v6, %v629_v14  ;;  %v1932_v14 = vld [vmem:[%s2637_s7] sm:$0xff] }
 0x436   : > { %v631_v16 = vmul.f32 1.442695, %v630_v15  ;;  %v1939_v15 = vld [vmem:[%s2631_s1 + $0x18] sm:$0xff] }
 0x437   : > { %844 = vmatpush.bf16.msrb.mxu1 %v1939_v15 }
 0x438   : > { %2023 = vpow2.f32 %v631_v16 }
 0x43b   : > { %v556_v19 = vpop.xlane.xlu1 %555 }
 0x43c   : > { %2025 = vrcp.f32 %v556_v19 }
 0x43e   : > { %v2024_v17 = vpop.eup %2023 }
 0x43f   : > { %v633_v18 = vsel %vm372_vm1, %v2024_v17, 0.0 }
 0x440   : > { %634 = vadd.xlane.f32.xlu2 %v633_v18 }
 0x442   : > { %v2026_v21 = vpop.eup %2025 }
 0x443   : > { %v558_v23 = vmul.f32 %v2026_v21, %v2022_v10  ;;  %v1936_v10 = vld [vmem:[%s2637_s7 + $0x20] sm:$0xff] }
 0x444   : > { %802 = vmatpush.bf16.msrb.mxu0 %v1936_v10 }
 0x445   : > { %v559_v28 = vpack.c.bf16 %v558_v23, %v558_v23  ;;  %v1938_v23 = vld [vmem:[%s2631_s1 + $0x10] sm:$0xff] }
 0x446   : > { %845 = vmatpush.bf16.msrb.mxu1 %v1938_v23 }
 0x448   : > { %803 = vmatpush.bf16.msrb.mxu0 %v1935_v11 }
 0x44c   : > { %804 = vmatpush.bf16.msrb.mxu0 %v1934_v12 }
 0x450   : > { %805 = vmatpush.bf16.msrb.mxu0 %v1933_v13 }
 0x454   : > { %806 = vmatpush.bf16.msrb.mxu0 %v1932_v14 }
 0x458   : > { %560 = vrot.lane.b32.xlu2 %v2260_v7, %s2642_s26  ;;  %v1795_v7 = vld [vmem:[%s2633_s3 + $0xc] sm:$0xf]  ;;  %s2677_s26 = smov 120  }
 0x459   : > { %v667_v29 = vsel %vm409_vm2, %v1795_v7, 0  ;;  %v2004_v7 = vld [vmem:[%s2632_s2 + $0x1] ss:$0 sm:$0xff] }
 0x4b3   : > { %v635_v20 = vpop.xlane.xlu2 %634 }
 0x4b4   : > { %2027 = vrcp.f32 %v635_v20 }
 0x4ba   : > { %v2028_v22 = vpop.eup %2027 }
 0x4bb   : > { %v637_v24 = vmul.f32 %v2028_v22, %v2024_v17  ;;  %v561_v25 = vpop.permute.xlu2 %560 }
 0x4bc   : > { %v566_v26 = vsel %vm409_vm2, %v561_v25, 0 }
 0x4bd   : > { %v638_v27 = vpack.c.bf16 %v637_v24, %v637_v24  ;;  %575 = vmatpush.bf16.msra.mxu2 %v566_v26  ;;  %v2003_v24 = vld [vmem:[%s2638_s8] ss:$0 sm:$0xff] }
 0x4bf   : > { %1794 = vmatmul.msk.bf16.vlgmr.msra.gmra.mxu3 %vm372_vm1, %v638_v27 }
 0x4c0   : > { %1790 = vmatmul.msk.bf16.vlgmr.msra.gmra.mxu2 %vm372_vm1, %v559_v28 }
 0x4c1   : > { %676 = vmatpush.bf16.msrb.mxu2 %v667_v29 }
 0x542   : > { %v656_v32 = vpop.f32.mrf.mxu3 }
 0x543   : > { %v660_v33 = vpack.c.bf16 %v656_v32, %v656_v32  ;;  %v577_v34 = vpop.f32.mrf.mxu2 }
 0x544   : > { %v581_v35 = vpack.c.bf16 %v577_v34, %v577_v34 }
 0x545   : > { %1796 = vmatmul.msk.bf16.vlgmr.msrb.gmra.mxu2 %vm372_vm1, %v660_v33 }
 0x546   : > { %1792 = vmatmul.msk.bf16.vlgmr.msra.gmra.mxu0 %vm372_vm1, %v581_v35 }
 0x54a   : > { %v658_v36 = vpop.f32.mrf.mxu3 }
 0x54b   : > { %v579_v37 = vpop.f32.mrf.mxu2 }
 0x5c3   : > { %v599_v38 = vpop.f32.mrf.mxu0 }
 0x5c4   : > { %v603_v39 = vadd.f32 %v599_v38, %v522_v8 }
 0x5c8   : > { %v678_v40 = vpop.f32.mrf.mxu2 }
 0x5c9   : > { %v682_v41 = vadd.f32 %v678_v40, %v603_v39 }
 0x5cb   : > { %v683_v43 = vadd.f32 %v682_v41, %v2252_v2  ;;  %v601_v44 = vpop.f32.mrf.mxu0 }
 0x5cd   : > { %v688_v45 = vadd.f32 %v2000_v42, %v683_v43 }
 0x5cf   : > { %v689_v46 = vsel %vm351_vm0, %v688_v45, 0.0  ;;  %v693_v47 = vmul.f32 %v688_v45, %v688_v45 }
 0x5d0   : > { %v680_v48 = vpop.f32.mrf.mxu2  ;;  %690 = vadd.xlane.f32.xlu1 %v689_v46 }
 0x5d1   : > { %v694_v49 = vsel %vm351_vm0, %v693_v47, 0.0 }
 0x5d2   : > { %695 = vadd.xlane.f32.xlu0 %v694_v49 }
 0x643   : > { %v691_v50 = vpop.xlane.xlu1 %690 }
 0x644   : > { %v692_v51 = vmul.f32 0.03125, %v691_v50 }
 0x645   : > { %v696_v52 = vpop.xlane.xlu0 %695 }
 0x646   : > { %v698_v53 = vmul.f32 %v692_v51, %v692_v51  ;;  %v697_v54 = vmul.f32 0.03125, %v696_v52  ;;  %v711_v62 = vsub.f32 %v688_v45, %v692_v51 }
 0x648   : > { %v699_v55 = vsub.f32 %v697_v54, %v698_v53 }
 0x64a   : > { %v700_v56 = vadd.f32 1e-05, %v699_v55 }
 0x64c   : > { %2029 = vrsqrt.f32 %v700_v56  ;;  %vm707_vm4 = vweird.f32 %v700_v56 }
 0x652   : > { %v2030_v57 = vpop.eup %2029 }
 0x653   : > { %v702_v2 = vmul.f32 %v2030_v57, %v700_v56  ;;  %vm708_vm3 = vweird.f32 %v2030_v57 }
 0x654   : > { %vm709_vm5 = vmor %vm707_vm4, %vm708_vm3 }
 0x655   : > { %v703_v58 = vmul.f32 %v2030_v57, %v702_v2  ;;  %v1838_v2 = vld [vmem:[%s2633_s3 + $0x10] sm:$0xf] }
 0x657   : > { %v704_v59 = vmul.f32 0.5, %v703_v58  ;;  %v992_v58 = vsel %vm409_vm2, %v1838_v2, 0 }
 0x659   : > { %v705_v60 = vsub.f32 1.5, %v704_v59 }
 0x65b   : > { %v706_v61 = vmul.f32 %v2030_v57, %v705_v60 }
 0x65d   : > { %v710_v0 = vsel %vm709_vm5, %v2030_v57, %v706_v61 }
 0x65e   : > { %v712_v1 = vmul.f32 %v711_v62, %v710_v0 }
 0x660   : > { %v717_v4 = vmul.f32 %v2001_v63, %v712_v1 }
 0x662   : > { %v722_v5 = vadd.f32 %v2002_v3, %v717_v4 }
 0x664   : > { %732 = vrot.lane.b32.xlu1 %v722_v5, %s2652_s23  ;;  %v728_v6 = vrot.slane %v722_v5, 1  ;;  %v724_v16 = vrot.slane %v722_v5, 7  ;;  %s2684_s23 = smov 40  }
 0x666   : > { %v731_v8 = vsel %vm730_vm6, %v728_v6, 0.0  ;;  %v727_v18 = vsel %vm726_vm7, 0.0, %v724_v16 }
 0x667   : > { %736 = vrot.lane.b32.xlu2 %v731_v8, %s2660_s14 }
 0x6c1   : > { %v737_v19 = vpop.permute.xlu2 %736 }
 0x6d6   : > { %v733_v17 = vpop.permute.xlu1 %732 }
 0x6d7   : > { %v739_v20 = vsel %vm351_vm0, %v727_v18, %v733_v17 }
 0x6d8   : > { %v741_v21 = vsel %vm740_vm8, %v739_v20, %v737_v19 }
 0x6d9   : > { %v742_v22 = vpack.c.bf16 %v741_v21, %v741_v21 }
 0x6db   : > { %1821 = vmatmul.msk.bf16.vlgmr.msrb.gmra.mxu0 %vm795_vm9, %v742_v22 }
 0x758   : > { %v808_v25 = vpop.f32.mrf.mxu0 }
 0x759   : > { %v2379_v26 = vadd.f32 %v2003_v24, %v808_v25 }
 0x75b   : > { %v812_v27 = vpack.c.bf16 %v2379_v26, %v2379_v26 }
 0x75d   : > { %1835 = vmatmul.msk.bf16.vlgmr.msrb.gmra.mxu1 %vm351_vm0, %v812_v27 }
 0x760   : > { %v810_v28 = vpop.f32.mrf.mxu0 }
 0x761   : > { %v1841_v28 = vld [vmem:[%s2633_s3 + $0x14] sm:$0xf] }
 0x7da   : > { %v847_v29 = vpop.f32.mrf.mxu1 }
 0x7db   : > { %v848_v30 = vadd.f32 %v2004_v7, %v847_v29  ;;  %v973_v7 = vsel %vm409_vm2, %v1841_v28, 0  ;;  %v2006_v28 = vld [vmem:[%s2635_s5 + $0x1] ss:$0 sm:$0xff] }
 0x7dc   : > { %982 = vmatpush.bf16.msra.mxu0 %v973_v7 }
 0x7dd   : > { %v2387_v31 = vpack.c.bf16 %v848_v30, %v848_v30 }
 0x7df   : > { %886 = vrot.lane.b32.xlu0 %v2387_v31, %s2660_s14  ;;  %853 = vrot.lane.b32.xlu2 %v2387_v31, %s2659_s21 }
 0x7e2   : > { %v849_v32 = vpop.f32.mrf.mxu1 }
 0x7e7   : > { %912 = vrot.lane.b32.xlu0 %v2387_v31, %s2676_s24 }
 0x7ef   : > { %910 = vrot.lane.b32.xlu0 %v2387_v31, %s2677_s26 }
 0x7f7   : > { %1086 = vrot.lane.b32.xlu0 %v2387_v31, %s2678_s25 }
 0x7ff   : > { %1007 = vrot.lane.b32.xlu0 %v2387_v31, %s2679_s27 }
 0x839   : > { %v854_v33 = vpop.permute.xlu2 %853 }
 0x83a   : > { %v859_v34 = vsel %vm372_vm1, %v854_v33, 0 }
 0x83b   : > { %868 = vmatpush.bf16.xpose.msrb.mxu3 %v859_v34 }
 0x842   : > { %1836 = vmatmul.msk.bf16.vlgmr.msrb.gmra.mxu3 %vm372_vm1, %v2387_v31 }
 0x851   : > { %v887_v35 = vpop.permute.xlu0 %886 }
 0x852   : > { %v892_v36 = vsel %vm409_vm2, %v887_v35, 0 }
 0x853   : > { %901 = vmatpush.bf16.msra.mxu2 %v892_v36 }
 0x857   : > { %1001 = vmatpush.bf16.msrb.mxu2 %v992_v58 }
 0x859   : > { %v913_v37 = vpop.permute.xlu0 %912 }
 0x85a   : > { %v918_v38 = vsel %vm372_vm1, %v913_v37, 0 }
 0x85b   : > { %927 = vmatpush.bf16.xpose.msra.mxu1 %v918_v38 }
 0x861   : > { %v911_v39 = vpop.permute.xlu0 %910 }
 0x862   : > { %1839 = vmatmul.msk.bf16.vlgmr.msra.gmra.mxu1 %vm372_vm1, %v911_v39 }
 0x869   : > { %v1087_v49 = vpop.permute.xlu0 %1086 }
 0x871   : > { %v1008_v52 = vpop.permute.xlu0 %1007 }
 0x8c5   : > { %v870_v40 = vpop.f32.mrf.mxu3 }
 0x8c6   : > { %v874_v41 = vsel %vm372_vm1, %v870_v40, -inf }
 0x8c7   : > { %875 = vmax.xlane.f32.xlu1 %v874_v41 }
 0x8cd   : > { %v872_v42 = vpop.f32.mrf.mxu3 }
 0x8df   : > { %v929_v43 = vpop.f32.mrf.mxu1 }
 0x8e0   : > { %1088 = vrot.lane.b32.xlu1 %v2387_v31, %s2680_s17  ;;  %v933_v44 = vsel %vm372_vm1, %v929_v43, -inf }
 0x8e1   : > { %934 = vmax.xlane.f32.xlu0 %v933_v44  ;;  %v1846_v44 = vld [vmem:[%s2633_s3 + $0x18] sm:$0xf] }
 0x8e7   : > { %v931_v45 = vpop.f32.mrf.mxu1 }
 0x8e8   : > { %v1070_v45 = vsel %vm409_vm2, %v1846_v44, 0 }
 0x8e9   : > { %1079 = vmatpush.bf16.msrb.mxu0 %v1070_v45 }
 0x93a   : > { %v876_v46 = vpop.xlane.xlu1 %875 }
 0x93b   : > { %v877_v47 = vsub.f32 %v870_v40, %v876_v46 }
 0x93d   : > { %v878_v48 = vmul.f32 1.442695, %v877_v47 }
 0x93f   : > { %2031 = vpow2.f32 %v878_v48 }
 0x945   : > { %v2032_v50 = vpop.eup %2031 }
 0x946   : > { %v880_v51 = vsel %vm372_vm1, %v2032_v50, 0.0 }
 0x947   : > { %881 = vadd.xlane.f32.xlu2 %v880_v51 }
 0x952   : > { %v1089_v63 = vpop.permute.xlu1 %1088 }
 0x953   : > { %v1094_v3 = vsel %vm372_vm1, %v1089_v63, 0 }
 0x954   : > { %v935_v53 = vpop.xlane.xlu0 %934 }
 0x955   : > { %v936_v54 = vsub.f32 %v929_v43, %v935_v53 }
 0x957   : > { %v937_v55 = vmul.f32 1.442695, %v936_v54 }
 0x959   : > { %2033 = vpow2.f32 %v937_v55 }
 0x95f   : > { %v2034_v56 = vpop.eup %2033  ;;  %1009 = vrot.lane.b32.xlu2 %v2387_v31, %s2681_s22 }
 0x960   : > { %v939_v57 = vsel %vm372_vm1, %v2034_v56, 0.0 }
 0x961   : > { %940 = vadd.xlane.f32.xlu0 %v939_v57 }
 0x9ba   : > { %v882_v59 = vpop.xlane.xlu2 %881 }
 0x9bb   : > { %2035 = vrcp.f32 %v882_v59 }
 0x9c1   : > { %v2036_v60 = vpop.eup %2035 }
 0x9c2   : > { %v884_v61 = vmul.f32 %v2036_v60, %v2032_v50  ;;  %v1010_v62 = vpop.permute.xlu2 %1009 }
 0x9c3   : > { %v1015_v0 = vsel %vm372_vm1, %v1010_v62, 0 }
 0x9c4   : > { %v885_v1 = vpack.c.bf16 %v884_v61, %v884_v61  ;;  %1024 = vmatpush.bf16.xpose.msrb.mxu1 %v1015_v0 }
 0x9c6   : > { %1837 = vmatmul.msk.bf16.vlgmr.msra.gmra.mxu2 %vm372_vm1, %v885_v1 }
 0x9c7   : > { %1103 = vmatpush.bf16.xpose.msra.mxu2 %v1094_v3  ;;  %v2005_v3 = vld [vmem:[%s2634_s4 + $0x1] ss:$0 sm:$0xff] }
 0x9cb   : > { %1844 = vmatmul.msk.bf16.vlgmr.msrb.gmra.mxu1 %vm372_vm1, %v1008_v52 }
 0x9d4   : > { %v941_v11 = vpop.xlane.xlu0 %940 }
 0x9d5   : > { %2037 = vrcp.f32 %v941_v11 }
 0x9db   : > { %v2038_v14 = vpop.eup %2037 }
 0x9dc   : > { %v943_v15 = vmul.f32 %v2038_v14, %v2034_v56  ;;  %v1850_v56 = vld [vmem:[%s2633_s3 + $0x1c] sm:$0xf] }
 0x9dd   : > { %v1149_v57 = vsel %vm409_vm2, %v1850_v56, 0 }
 0x9de   : > { %v944_v20 = vpack.c.bf16 %v943_v15, %v943_v15 }
 0xa48   : > { %v1026_v4 = vpop.f32.mrf.mxu1 }
 0xa49   : > { %v903_v5 = vpop.f32.mrf.mxu2  ;;  %v1030_v6 = vsel %vm372_vm1, %v1026_v4, -inf }
 0xa4a   : > { %v907_v8 = vpack.c.bf16 %v903_v5, %v903_v5  ;;  %1031 = vmax.xlane.f32.xlu1 %v1030_v6 }
 0xa4c   : > { %1843 = vmatmul.msk.bf16.vlgmr.msrb.gmra.mxu2 %vm372_vm1, %v907_v8 }
 0xa50   : > { %v1028_v9 = vpop.f32.mrf.mxu1 }
 0xa51   : > { %v905_v10 = vpop.f32.mrf.mxu2 }
 0xa5c   : > { %1848 = vmatmul.msk.bf16.vlgmr.msra.gmra.mxu2 %vm372_vm1, %v1087_v49 }
 0xa63   : > { %945 = vrot.lane.b32.xlu1 %v2387_v31, %s2682_s28 }
 0xabd   : > { %v1032_v12 = vpop.xlane.xlu1 %1031 }
 0xabe   : > { %v1033_v18 = vsub.f32 %v1026_v4, %v1032_v12 }
 0xac0   : > { %v1034_v21 = vmul.f32 1.442695, %v1033_v18  ;;  %v1944_v18 = vld [vmem:[%s2637_s7 + $0x50] sm:$0xff] }
 0xac2   : > { %2039 = vpow2.f32 %v1034_v21 }
 0xac8   : > { %v2040_v24 = vpop.eup %2039 }
 0xac9   : > { %v1036_v27 = vsel %vm372_vm1, %v2040_v24, 0.0 }
 0xacf   : > { %v2428_v13 = vpop.f32.mrf.mxu2 }
 0xad5   : > { %v946_v16 = vpop.permute.xlu1 %945 }
 0xad6   : > { %v951_v17 = vsel %vm409_vm2, %v946_v16, 0 }
 0xad7   : > { %960 = vmatpush.bf16.msra.mxu3 %v951_v17  ;;  %v1005_v19 = vpop.f32.mrf.mxu2 }
 0xada   : > { %1840 = vmatmul.msk.bf16.vlgmr.msra.gmra.mxu3 %vm372_vm1, %v944_v20  ;;  %v1943_v20 = vld [vmem:[%s2637_s7 + $0x48] sm:$0xff] }
 0xadf   : > { %v1105_v22 = vpop.f32.mrf.mxu2 }
 0xae0   : > { %v1109_v23 = vsel %vm372_vm1, %v1105_v22, -inf }
 0xae1   : > { %1110 = vmax.xlane.f32.xlu2 %v1109_v23 }
 0xae7   : > { %v1107_v25 = vpop.f32.mrf.mxu2 }
 0xae9   : > { %1037 = vadd.xlane.f32.xlu2 %v1036_v27 }
 0xb01   : > { %1042 = vrot.lane.b32.xlu2 %v2387_v31, %s2683_s29 }
 0xb54   : > { %v1111_v29 = vpop.xlane.xlu2 %1110 }
 0xb55   : > { %v1112_v30 = vsub.f32 %v1105_v22, %v1111_v29 }
 0xb57   : > { %v1113_v32 = vmul.f32 1.442695, %v1112_v30  ;;  %v2007_v30 = vld [vmem:[%s2636_s6 + $0x1] ss:$0 sm:$0xff] }
 0xb59   : > { %2041 = vpow2.f32 %v1113_v32 }
 0xb5c   : > { %v1038_v33 = vpop.xlane.xlu2 %1037 }
 0xb5d   : > { %2043 = vrcp.f32 %v1038_v33  ;;  %v962_v34 = vpop.f32.mrf.mxu3 }
 0xb5e   : > { %v966_v35 = vpack.c.bf16 %v962_v34, %v962_v34 }
 0xb5f   : > { %v2042_v36 = vpop.eup %2041 }
 0xb60   : > { %1842 = vmatmul.msk.bf16.vlgmr.msra.gmra.mxu0 %vm372_vm1, %v966_v35  ;;  %v1115_v37 = vsel %vm372_vm1, %v2042_v36, 0.0 }
 0xb61   : > { %1116 = vadd.xlane.f32.xlu0 %v1115_v37  ;;  %v1941_v37 = vld [vmem:[%s2637_s7 + $0x38] sm:$0xff] }
 0xb63   : > { %v2044_v38 = vpop.eup %2043 }
 0xb64   : > { %v1040_v39 = vmul.f32 %v2044_v38, %v2040_v24  ;;  %v1043_v40 = vpop.permute.xlu2 %1042  ;;  %v1940_v38 = vld [vmem:[%s2637_s7 + $0x30] sm:$0xff] }
 0xb65   : > { %v1048_v41 = vsel %vm409_vm2, %v1043_v40, 0  ;;  %v964_v42 = vpop.f32.mrf.mxu3 }
 0xb66   : > { %v1041_v43 = vpack.c.bf16 %v1040_v39, %v1040_v39  ;;  %1057 = vmatpush.bf16.msrb.mxu3 %v1048_v41  ;;  %v1947_v39 = vld [vmem:[%s2631_s1 + $0x28] sm:$0xff] }
 0xb67   : > { %1327 = vmatpush.bf16.msrb.mxu2 %v1947_v39 }
 0xb69   : > { %1845 = vmatmul.msk.bf16.vlgmr.msrb.gmra.mxu3 %vm372_vm1, %v1041_v43 }
 0xb6a   : > { %1158 = vmatpush.bf16.msra.mxu3 %v1149_v57 }
 0xb75   : > { %1121 = vrot.lane.b32.xlu0 %v2387_v31, %s2684_s23 }
 0xbd4   : > { %v1117_v46 = vpop.xlane.xlu0 %1116 }
 0xbd5   : > { %2045 = vrcp.f32 %v1117_v46 }
 0xbdb   : > { %v2046_v48 = vpop.eup %2045 }
 0xbdc   : > { %v1119_v50 = vmul.f32 %v2046_v48, %v2042_v36  ;;  %v1942_v36 = vld [vmem:[%s2637_s7 + $0x40] sm:$0xff] }
 0xbdd   : > { %v984_v47 = vpop.f32.mrf.mxu0  ;;  %v2008_v48 = vld [vmem:[%s2638_s8 + $0x1] ss:$0 sm:$0xff] }
 0xbde   : > { %v1120_v53 = vpack.c.bf16 %v1119_v50, %v1119_v50  ;;  %v1004_v59 = vadd.f32 %v2428_v13, %v984_v47  ;;  %v1946_v47 = vld [vmem:[%s2631_s1 + $0x20] sm:$0xff] }
 0xbdf   : > { %1328 = vmatpush.bf16.msrb.mxu2 %v1946_v47 }
 0xbe5   : > { %v986_v49 = vpop.f32.mrf.mxu0 }
 0xbe7   : > { %v1122_v51 = vpop.permute.xlu0 %1121 }
 0xbe8   : > { %v1127_v52 = vsel %vm409_vm2, %v1122_v51, 0 }
 0xbe9   : > { %1136 = vmatpush.bf16.msra.mxu1 %v1127_v52 }
 0xbec   : > { %v1059_v54 = vpop.f32.mrf.mxu3  ;;  %1849 = vmatmul.msk.bf16.vlgmr.msra.gmra.mxu1 %vm372_vm1, %v1120_v53  ;;  %v2009_v53 = vld [vmem:[%s2632_s2 + $0x2] ss:$0 sm:$0xff] }
 0xbed   : > { %v1063_v31 = vpack.c.bf16 %v1059_v54, %v1059_v54 }
 0xbef   : > { %1847 = vmatmul.msk.bf16.vlgmr.msrb.gmra.mxu0 %vm372_vm1, %v1063_v31 }
 0xbf4   : > { %v1061_v55 = vpop.f32.mrf.mxu3 }
 0xc69   : > { %v1138_v2 = vpop.f32.mrf.mxu1 }
 0xc6a   : > { %v1142_v58 = vpack.c.bf16 %v1138_v2, %v1138_v2 }
 0xc6c   : > { %v1081_v60 = vpop.f32.mrf.mxu0  ;;  %1851 = vmatmul.msk.bf16.vlgmr.msra.gmra.mxu3 %vm372_vm1, %v1142_v58 }
 0xc6d   : > { %v1085_v61 = vadd.f32 %v1081_v60, %v1004_v59 }
 0xc71   : > { %v1140_v62 = vpop.f32.mrf.mxu1 }
 0xc74   : > { %v1083_v63 = vpop.f32.mrf.mxu0 }
 0xcef   : > { %v1160_v0 = vpop.f32.mrf.mxu3 }
 0xcf0   : > { %v1164_v1 = vadd.f32 %v1160_v0, %v1085_v61 }
 0xcf2   : > { %v1165_v4 = vadd.f32 %v1164_v1, %v2379_v26  ;;  %v1945_v26 = vld [vmem:[%s2637_s7 + $0x58] sm:$0xff] }
 0xcf3   : > { %1284 = vmatpush.bf16.msra.mxu0 %v1945_v26 }
 0xcf4   : > { %v1171_v5 = vadd.f32 %v2005_v3, %v1165_v4 }
 0xcf6   : > { %v1172_v6 = vsel %vm351_vm0, %v1171_v5, 0.0  ;;  %v1176_v8 = vmul.f32 %v1171_v5, %v1171_v5 }
 0xcf7   : > { %1173 = vadd.xlane.f32.xlu1 %v1172_v6  ;;  %v1162_v9 = vpop.f32.mrf.mxu3  ;;  %1285 = vmatpush.bf16.msra.mxu0 %v1944_v18 }
 0xcf8   : > { %v1177_v10 = vsel %vm351_vm0, %v1176_v8, 0.0 }
 0xcf9   : > { %1178 = vadd.xlane.f32.xlu0 %v1177_v10 }
 0xcfb   : > { %1286 = vmatpush.bf16.msra.mxu0 %v1943_v20 }
 0xcff   : > { %1287 = vmatpush.bf16.msra.mxu0 %v1942_v36 }
 0xd03   : > { %1288 = vmatpush.bf16.msra.mxu0 %v1941_v37 }
 0xd07   : > { %1289 = vmatpush.bf16.msra.mxu0 %v1940_v38 }
 0xd6a   : > { %v1174_v11 = vpop.xlane.xlu1 %1173 }
 0xd6b   : > { %v1175_v12 = vmul.f32 0.03125, %v1174_v11 }
 0xd6c   : > { %v1179_v13 = vpop.xlane.xlu0 %1178 }
 0xd6d   : > { %v1181_v14 = vmul.f32 %v1175_v12, %v1175_v12  ;;  %v1180_v15 = vmul.f32 0.03125, %v1179_v13  ;;  %v1194_v27 = vsub.f32 %v1171_v5, %v1175_v12  ;;  %v1909_v5 = vld [vmem:[%s2633_s3 + $0x20] sm:$0xf] }
 0xd6e   : > { %v1475_v6 = vsel %vm409_vm2, %v1909_v5, 0 }
 0xd6f   : > { %v1182_v16 = vsub.f32 %v1180_v15, %v1181_v14 }
 0xd71   : > { %v1183_v17 = vadd.f32 1e-05, %v1182_v16 }
 0xd73   : > { %2047 = vrsqrt.f32 %v1183_v17  ;;  %vm1190_vm11 = vweird.f32 %v1183_v17 }
 0xd79   : > { %v2048_v19 = vpop.eup %2047 }
 0xd7a   : > { %v1185_v21 = vmul.f32 %v2048_v19, %v1183_v17  ;;  %vm1191_vm10 = vweird.f32 %v2048_v19 }
 0xd7b   : > { %vm1192_vm12 = vmor %vm1190_vm11, %vm1191_vm10 }
 0xd7c   : > { %v1186_v22 = vmul.f32 %v2048_v19, %v1185_v21 }
 0xd7e   : > { %v1187_v23 = vmul.f32 0.5, %v1186_v22 }
 0xd80   : > { %v1188_v24 = vsub.f32 1.5, %v1187_v23 }
 0xd82   : > { %v1189_v25 = vmul.f32 %v2048_v19, %v1188_v24 }
 0xd84   : > { %v1193_v7 = vsel %vm1192_vm12, %v2048_v19, %v1189_v25 }
 0xd85   : > { %v1195_v29 = vmul.f32 %v1194_v27, %v1193_v7 }
 0xd87   : > { %v1201_v32 = vmul.f32 %v2006_v28, %v1195_v29 }
 0xd89   : > { %v1207_v33 = vadd.f32 %v2007_v30, %v1201_v32 }
 0xd8b   : > { %1215 = vrot.lane.b32.xlu2 %v1207_v33, %s2685_s11  ;;  %v1212_v34 = vrot.slane %v1207_v33, 1  ;;  %v1209_v41 = vrot.slane %v1207_v33, 7  ;;  %s321_s11 = sand.u32 1, %s2121_s10  }
 0xd8c   : > { %s1771_s15 = sshll.u32 %s321_s11, 3 }
 0xd8d   : > { %v1214_v35 = vsel %vm730_vm6, %v1212_v34, 0.0  ;;  %v1211_v42 = vsel %vm726_vm7, 0.0, %v1209_v41  ;;  %s323_s13 = scalar_lea.vmem [#allocation2], %s1771_s15 }
 0xd93   : > { %1219 = vrot.lane.b32.xlu2 %v1214_v35, %s2686_s18 }
 0xde5   : > { %v1216_v40 = vpop.permute.xlu2 %1215 }
 0xde6   : > { %v1222_v43 = vsel %vm351_vm0, %v1211_v42, %v1216_v40 }
 0xded   : > { %v1220_v44 = vpop.permute.xlu2 %1219 }
 0xdee   : > { %v1223_v45 = vsel %vm740_vm8, %v1222_v43, %v1220_v44 }
 0xdef   : > { %v1224_v46 = vpack.c.bf16 %v1223_v45, %v1223_v45 }
 0xdf1   : > { %1892 = vmatmul.msk.bf16.vlgmr.msra.gmra.mxu0 %vm795_vm9, %v1224_v46 }
 0xe6e   : > { %v1291_v49 = vpop.f32.mrf.mxu0 }
 0xe6f   : > { %v2505_v50 = vadd.f32 %v2008_v48, %v1291_v49 }
 0xe71   : > { %v1295_v51 = vpack.c.bf16 %v2505_v50, %v2505_v50 }
 0xe73   : > { %1906 = vmatmul.msk.bf16.vlgmr.msrb.gmra.mxu2 %vm351_vm0, %v1295_v51 }
 0xe76   : > { %v1293_v52 = vpop.f32.mrf.mxu0 }
 0xef6   : > { %v1330_v54 = vpop.f32.mrf.mxu2 }
 0xef7   : > { %v1331_v31 = vadd.f32 %v2009_v53, %v1330_v54 }
 0xef9   : > { %v2513_v55 = vpack.c.bf16 %v1331_v31, %v1331_v31 }
 0xefb   : > { %1369 = vrot.lane.b32.xlu0 %v2513_v55, %s2686_s18  ;;  %1336 = vrot.lane.b32.xlu2 %v2513_v55, %s2687_s16  ;;  %s1703_s16 = scalar_lea.hbm %s2639_s9, %s1927_s20  ;;  %s2087_s18 = scalar_lea.hbm %s2639_s9, 16 }
 0xefe   : > { %v1332_v56 = vpop.f32.mrf.mxu2 }
 0xf03   : > { %1393 = vrot.lane.b32.xlu0 %v2513_v55, %s2677_s26 }
 0xf0b   : > { %1569 = vrot.lane.b32.xlu0 %v2513_v55, %s2678_s25 }
 0xf55   : > { %v1337_v57 = vpop.permute.xlu2 %1336 }
 0xf56   : > { %v1342_v2 = vsel %vm372_vm1, %v1337_v57, 0 }
 0xf57   : > { %1351 = vmatpush.bf16.xpose.msrb.mxu1 %v1342_v2 }
 0xf5e   : > { %1907 = vmatmul.msk.bf16.vlgmr.msrb.gmra.mxu1 %vm372_vm1, %v2513_v55 }
 0xf6d   : > { %v1370_v58 = vpop.permute.xlu0 %1369 }
 0xf6e   : > { %v1375_v59 = vsel %vm409_vm2, %v1370_v58, 0 }
 0xf6f   : > { %1384 = vmatpush.bf16.msrb.mxu3 %v1375_v59 }
 0xf73   : > { %1484 = vmatpush.bf16.msra.mxu3 %v1475_v6 }
 0xf75   : > { %v1394_v16 = vpop.permute.xlu0 %1393 }
 0xf7d   : > { %v1570_v22 = vpop.permute.xlu0 %1569 }
 0xfdb   : > { %v1353_v60 = vpop.f32.mrf.mxu1 }
 0xfdc   : > { %v1357_v61 = vsel %vm372_vm1, %v1353_v60, -inf }
 0xfdd   : > { %1358 = vmax.xlane.f32.xlu2 %v1357_v61 }
 0xfe3   : > { %v1355_v62 = vpop.f32.mrf.mxu1 }
 0xfe4   : > { %v1912_v62 = vld [vmem:[%s2633_s3 + $0x24] sm:$0xf] }
 0xff5   : > { %1571 = vrot.lane.b32.xlu2 %v2513_v55, %s2680_s17  ;;  %s1693_s17 = scalar_lea.sflag [#allocation3], %s321_s11 }
0x1050   : > { %v1359_v63 = vpop.xlane.xlu2 %1358 }
0x1051   : > { %v1360_v0 = vsub.f32 %v1353_v60, %v1359_v63  ;;  %v1456_v63 = vsel %vm409_vm2, %v1912_v62, 0 }
0x1052   : > { %1465 = vmatpush.bf16.msra.mxu1 %v1456_v63 }
0x1053   : > { %v1361_v1 = vmul.f32 1.442695, %v1360_v0 }
0x1055   : > { %2049 = vpow2.f32 %v1361_v1  ;;  %v1917_v1 = vld [vmem:[%s2633_s3 + $0x28] sm:$0xf] }
0x1058   : > { %v1572_v11 = vpop.permute.xlu2 %1571 }
0x1059   : > { %v1577_v13 = vsel %vm372_vm1, %v1572_v11, 0 }
0x105b   : > { %v2050_v3 = vpop.eup %2049 }
0x105c   : > { %v1363_v4 = vsel %vm372_vm1, %v2050_v3, 0.0 }
0x105d   : > { %1364 = vadd.xlane.f32.xlu1 %v1363_v4 }
0x1076   : > { %1395 = vrot.lane.b32.xlu1 %v2513_v55, %s2676_s24  ;;  %s1705_s24 = sshll.u32 %s323_s13, 4  ;;  %s1706_s24 = int_to_ptr.vmem [resolvable:$true] %s1705_s24 }
0x107e   : > { %1492 = vrot.lane.b32.xlu1 %v2513_v55, %s2681_s22 }
0x1086   : > { %1490 = vrot.lane.b32.xlu1 %v2513_v55, %s2679_s27  ;;  %s1707_s27 = sshll.u32 %s1703_s16, 4  ;;  %s1708_s27 = int_to_ptr.hbm [resolvable:$true] %s1707_s27 }
0x1087   : > { %s2081_s22 = sshra.s32 %s1708_s27, 4  ;;  %s2082_s22 = int_to_ptr.hbm [resolvable:$true] %s2081_s22 }
0x1088   : > { %p2088_p0 = scmp.lt.s32.totalorder %s2082_s22, %s2639_s9 }
0x10d0   : > { %v1365_v8 = vpop.xlane.xlu1 %1364 }
0x10d1   : > { %2051 = vrcp.f32 %v1365_v8 }
0x10d7   : > { %v2052_v9 = vpop.eup %2051 }
0x10d8   : > { %v1367_v10 = vmul.f32 %v2052_v9, %v2050_v3 }
0x10da   : > { %v1368_v12 = vpack.c.bf16 %v1367_v10, %v1367_v10 }
0x10dc   : > { %1908 = vmatmul.msk.bf16.vlgmr.msrb.gmra.mxu3 %vm372_vm1, %v1368_v12 }
0x10dd   : > { %1586 = vmatpush.bf16.xpose.msrb.mxu3 %v1577_v13 }
0x10e8   : > { %v1396_v14 = vpop.permute.xlu1 %1395 }
0x10e9   : > { %v1401_v15 = vsel %vm372_vm1, %v1396_v14, 0 }
0x10ea   : > { %1410 = vmatpush.bf16.xpose.msra.mxu2 %v1401_v15  ;;  %v1921_v15 = vld [vmem:[%s2633_s3 + $0x2c] sm:$0xf] }
0x10f0   : > { %v1493_v17 = vpop.permute.xlu1 %1492 }
0x10f1   : > { %v1498_v26 = vsel %vm372_vm1, %v1493_v17, 0  ;;  %1910 = vmatmul.msk.bf16.vlgmr.msra.gmra.mxu2 %vm372_vm1, %v1394_v16  ;;  %v1632_v16 = vsel %vm409_vm2, %v1921_v15, 0 }
0x10f2   : > { %1507 = vmatpush.bf16.xpose.msrb.mxu2 %v1498_v26 }
0x10f8   : > { %v1491_v18 = vpop.permute.xlu1 %1490 }
0x1101   : > { %1915 = vmatmul.msk.bf16.vlgmr.msrb.gmra.mxu2 %vm372_vm1, %v1491_v18 }
0x115f   : > { %v1386_v19 = vpop.f32.mrf.mxu3 }
0x1160   : > { %v1390_v20 = vpack.c.bf16 %v1386_v19, %v1386_v19 }
0x1162   : > { %1914 = vmatmul.msk.bf16.vlgmr.msra.gmra.mxu3 %vm372_vm1, %v1390_v20 }
0x1167   : > { %v1388_v21 = vpop.f32.mrf.mxu3 }
0x1172   : > { %1919 = vmatmul.msk.bf16.vlgmr.msrb.gmra.mxu3 %vm372_vm1, %v1570_v22 }
0x1174   : > { %v1412_v23 = vpop.f32.mrf.mxu2 }
0x1175   : > { %v1416_v24 = vsel %vm372_vm1, %v1412_v23, -inf }
0x1176   : > { %1417 = vmax.xlane.f32.xlu0 %v1416_v24 }
0x117c   : > { %v1414_v25 = vpop.f32.mrf.mxu2 }
0x1184   : > { %v1509_v27 = vpop.f32.mrf.mxu2 }
0x1185   : > { %v1513_v28 = vsel %vm372_vm1, %v1509_v27, -inf }
0x1186   : > { %1514 = vmax.xlane.f32.xlu2 %v1513_v28  ;;  %v2010_v28 = vld [vmem:[%s2634_s4 + $0x2] ss:$0 sm:$0xff] }
0x118c   : > { %v1511_v7 = vpop.f32.mrf.mxu2 }
0x11e5   : > { %v2551_v29 = vpop.f32.mrf.mxu3 }
0x11e9   : > { %v1418_v30 = vpop.xlane.xlu0 %1417 }
0x11ea   : > { %v1419_v32 = vsub.f32 %v1412_v23, %v1418_v30 }
0x11ec   : > { %v1420_v33 = vmul.f32 1.442695, %v1419_v32 }
0x11ed   : > { %v1488_v34 = vpop.f32.mrf.mxu3 }
0x11ee   : > { %2053 = vpow2.f32 %v1420_v33 }
0x11f4   : > { %v2054_v35 = vpop.eup %2053 }
0x11f5   : > { %v1588_v36 = vpop.f32.mrf.mxu3  ;;  %v1422_v37 = vsel %vm372_vm1, %v2054_v35, 0.0 }
0x11f6   : > { %1423 = vadd.xlane.f32.xlu0 %v1422_v37  ;;  %v1592_v38 = vsel %vm372_vm1, %v1588_v36, -inf }
0x11f7   : > { %1593 = vmax.xlane.f32.xlu1 %v1592_v38 }
0x11f9   : > { %v1515_v39 = vpop.xlane.xlu2 %1514 }
0x11fa   : > { %v1516_v40 = vsub.f32 %v1509_v27, %v1515_v39 }
0x11fc   : > { %v1517_v41 = vmul.f32 1.442695, %v1516_v40 }
0x11fd   : > { %v1590_v42 = vpop.f32.mrf.mxu3 }
0x11fe   : > { %2055 = vpow2.f32 %v1517_v41 }
0x1204   : > { %v2056_v43 = vpop.eup %2055 }
0x1205   : > { %v1519_v44 = vsel %vm372_vm1, %v2056_v43, 0.0 }
0x1206   : > { %1520 = vadd.xlane.f32.xlu2 %v1519_v44 }
0x1210   : > { %1428 = vrot.lane.b32.xlu1 %v2513_v55, %s2682_s28  ;;  %s2083_s28 = scalar_lea.hbm %s2082_s22, 8 }
0x1211   : > { %p2084_p11 = scmp.ne.s32.totalorder %s2082_s22, %s2083_s28  ;;  %p2089_p1 = scmp.lt.s32.totalorder %s2087_s18, %s2083_s28 }
0x1213   : > { %p2085_p12 = pnand %p2084_p11, %p2231_p5  ;;  %p2090_p2 = por %p2089_p1, %p2088_p0 }
0x1215   : > { %p2086_p13 = pneg %p2085_p12 }
0x1217   : > { %p2091_p3 = pnand %p2090_p2, %p2086_p13 }
0x121e   : > { %1525 = vrot.lane.b32.xlu2 %v2513_v55, %s2683_s29 }
0x1269   : > { %v1424_v49 = vpop.xlane.xlu0 %1423 }
0x126a   : > { %v1594_v45 = vpop.xlane.xlu1 %1593 }
0x126b   : > { %v1595_v46 = vsub.f32 %v1588_v36, %v1594_v45 }
0x126d   : > { %v1596_v47 = vmul.f32 1.442695, %v1595_v46 }
0x126f   : > { %2057 = vpow2.f32 %v1596_v47 }
0x1270   : > { %2059 = vrcp.f32 %v1424_v49 }
0x1275   : > { %v2058_v48 = vpop.eup %2057 }
0x1276   : > { %v1598_v51 = vsel %vm372_vm1, %v2058_v48, 0.0  ;;  %v2060_v53 = vpop.eup %2059 }
0x1277   : > { %1599 = vadd.xlane.f32.xlu0 %v1598_v51  ;;  %v1426_v54 = vmul.f32 %v2060_v53, %v2054_v35 }
0x1279   : > { %v1521_v52 = vpop.xlane.xlu2 %1520  ;;  %v1427_v58 = vpack.c.bf16 %v1426_v54, %v1426_v54 }
0x127a   : > { %2061 = vrcp.f32 %v1521_v52  ;;  %v2012_v52 = vld [vmem:[%s2636_s6 + $0x2] ss:$0 sm:$0xff] }
0x1280   : > { %v2062_v59 = vpop.eup %2061 }
0x1281   : > { %v1526_v31 = vpop.permute.xlu2 %1525  ;;  %v1523_v60 = vmul.f32 %v2062_v59, %v2056_v43 }
0x1282   : > { %v1429_v56 = vpop.permute.xlu1 %1428  ;;  %v1531_v2 = vsel %vm409_vm2, %v1526_v31, 0 }
0x1283   : > { %v1434_v57 = vsel %vm409_vm2, %v1429_v56, 0  ;;  %v1524_v61 = vpack.c.bf16 %v1523_v60, %v1523_v60 }
0x1284   : > { %1443 = vmatpush.bf16.msrb.mxu0 %v1434_v57 }
0x1287   : > { %1911 = vmatmul.msk.bf16.vlgmr.msrb.gmra.mxu0 %vm372_vm1, %v1427_v58 }
0x1288   : > { %1540 = vmatpush.bf16.msra.mxu0 %v1531_v2 }
0x128b   : > { %1604 = vrot.lane.b32.xlu0 %v2513_v55, %s2684_s23  ;;  %v1553_v55 = vsel %vm409_vm2, %v1917_v1, 0 }
0x128c   : > { %1562 = vmatpush.bf16.msrb.mxu1 %v1553_v55  ;;  %1641 = vmatpush.bf16.msrb.mxu0 %v1632_v16 }
0x1297   : > { %1916 = vmatmul.msk.bf16.vlgmr.msra.gmra.mxu0 %vm372_vm1, %v1524_v61 }
0x12ea   : > { %v1600_v0 = vpop.xlane.xlu0 %1599 }
0x12eb   : > { %2063 = vrcp.f32 %v1600_v0 }
0x12f1   : > { %v2064_v3 = vpop.eup %2063 }
0x12f2   : > { %v1602_v4 = vmul.f32 %v2064_v3, %v2058_v48  ;;  %v2011_v48 = vld [vmem:[%s2635_s5 + $0x2] ss:$0 sm:$0xff] }
0x12f4   : > { %v1603_v8 = vpack.c.bf16 %v1602_v4, %v1602_v4 }
0x12fd   : > { %v1605_v5 = vpop.permute.xlu0 %1604 }
0x12fe   : > { %v1610_v6 = vsel %vm409_vm2, %v1605_v5, 0 }
0x12ff   : > { %1619 = vmatpush.bf16.msra.mxu2 %v1610_v6 }
0x1302   : > { %1920 = vmatmul.msk.bf16.vlgmr.msra.gmra.mxu2 %vm372_vm1, %v1603_v8 }
0x1304   : > { %v1445_v9 = vpop.f32.mrf.mxu0 }
0x1305   : > { %v1449_v10 = vpack.c.bf16 %v1445_v9, %v1445_v9 }
0x1307   : > { %1913 = vmatmul.msk.bf16.vlgmr.msra.gmra.mxu1 %vm372_vm1, %v1449_v10 }
0x130c   : > { %v1447_v11 = vpop.f32.mrf.mxu0 }
0x1314   : > { %v1542_v12 = vpop.f32.mrf.mxu0 }
0x1315   : > { %v1546_v13 = vpack.c.bf16 %v1542_v12, %v1542_v12 }
0x1317   : > { %1918 = vmatmul.msk.bf16.vlgmr.msrb.gmra.mxu1 %vm372_vm1, %v1546_v13 }
0x131c   : > { %v1544_v14 = vpop.f32.mrf.mxu0 }
0x1384   : > { %v1467_v17 = vpop.f32.mrf.mxu1 }
0x1385   : > { %v1621_v26 = vpop.f32.mrf.mxu2  ;;  %v1487_v21 = vadd.f32 %v2551_v29, %v1467_v17 }
0x1386   : > { %v1625_v18 = vpack.c.bf16 %v1621_v26, %v1621_v26 }
0x1388   : > { %1922 = vmatmul.msk.bf16.vlgmr.msrb.gmra.mxu0 %vm372_vm1, %v1625_v18 }
0x138c   : > { %v1469_v19 = vpop.f32.mrf.mxu1 }
0x138d   : > { %v1623_v20 = vpop.f32.mrf.mxu2 }
0x1394   : > { %v1564_v22 = vpop.f32.mrf.mxu1 }
0x1395   : > { %v1568_v23 = vadd.f32 %v1564_v22, %v1487_v21 }
0x139c   : > { %v1566_v24 = vpop.f32.mrf.mxu1 }
0x1405   : > { %v1643_v25 = vpop.f32.mrf.mxu0 }
0x1406   : > { %v1647_v27 = vadd.f32 %v1643_v25, %v1568_v23 }
0x1408   : > { %v1648_v7 = vadd.f32 %v1647_v27, %v2505_v50 }
0x140a   : > { %v1654_v30 = vadd.f32 %v2010_v28, %v1648_v7 }
0x140c   : > { %v1655_v32 = vsel %vm351_vm0, %v1654_v30, 0.0  ;;  %v1659_v33 = vmul.f32 %v1654_v30, %v1654_v30 }
0x140d   : > { %1656 = vadd.xlane.f32.xlu1 %v1655_v32  ;;  %v1645_v34 = vpop.f32.mrf.mxu0 }
0x140e   : > { %v1660_v29 = vsel %vm351_vm0, %v1659_v33, 0.0 }
0x140f   : > { %1661 = vadd.xlane.f32.xlu0 %v1660_v29 }
0x1480   : > { %v1657_v35 = vpop.xlane.xlu1 %1656 }
0x1481   : > { %v1658_v36 = vmul.f32 0.03125, %v1657_v35 }
0x1482   : > { %v1662_v37 = vpop.xlane.xlu0 %1661 }
0x1483   : > { %v1664_v38 = vmul.f32 %v1658_v36, %v1658_v36  ;;  %v1663_v39 = vmul.f32 0.03125, %v1662_v37  ;;  %v1677_v47 = vsub.f32 %v1654_v30, %v1658_v36 }
0x1485   : > { %v1665_v40 = vsub.f32 %v1663_v39, %v1664_v38 }
0x1487   : > { %v1666_v41 = vadd.f32 1e-05, %v1665_v40 }
0x1489   : > { %2065 = vrsqrt.f32 %v1666_v41  ;;  %vm1673_vm14 = vweird.f32 %v1666_v41 }
0x148f   : > { %v2066_v50 = vpop.eup %2065 }
0x1490   : > { %v1668_v42 = vmul.f32 %v2066_v50, %v1666_v41  ;;  %vm1674_vm13 = vweird.f32 %v2066_v50 }
0x1491   : > { %vm1675_vm15 = vmor %vm1673_vm14, %vm1674_vm13 }
0x1492   : > { %v1669_v43 = vmul.f32 %v2066_v50, %v1668_v42 }
0x1494   : > { %v1670_v44 = vmul.f32 0.5, %v1669_v43 }
0x1496   : > { %v1671_v45 = vsub.f32 1.5, %v1670_v44 }
0x1498   : > { %v1672_v46 = vmul.f32 %v2066_v50, %v1671_v45 }
0x149a   : > { %v1676_v49 = vsel %vm1675_vm15, %v2066_v50, %v1672_v46 }
0x149b   : > { %v1678_v51 = vmul.f32 %v1677_v47, %v1676_v49 }
0x149d   : > { %v1684_v53 = vmul.f32 %v2011_v48, %v1678_v51 }
0x149f   : > { %v1690_v54 = vadd.f32 %v2012_v52, %v1684_v53 }
0x14a1   : > { %1691 = vst.msk [vmem:[%s323_s13] sm:$0xff] %vm351_vm0, %v1690_v54 }
0x14a2   : > { %2094 = shalt.err (!%p2091_p3)
}
0x14a3   : > { %1948 = dma.vmem_to_hbm [thread:$0]  (%p2231_p5), %s1706_s24, 128, %s1708_s27, %s1693_s17  }
0x14a4 PF: > { %s2688_s11 = sld [smem:[#allocation5_spill]]  ;;  %p1954_p4 = scmp.ge.s32.totalorder %s2129_s12, 2 }
0x14a6   : > { %p1951_p7 = pnand %p1954_p4, %p2235_p6 }
0x14a8   : > { %p1952_p8 = pneg %p1951_p7 }
0x14aa   : > { %s1719_s0 = sand.u32 1, %s2688_s11  }
0x14ab   : > { %s1720_s14 = scalar_lea.sflag [#allocation3], %s1719_s0 }
0x14ac   : > { %2112 = dma.done.wait (%p1952_p8), %s1720_s14, 128  }
0x14ad   : > { %2114 = vsyncadd (%p1952_p8), %s1720_s14, 4294967168  ;;  %s2690_s12 = sld [smem:[#allocation7_spill]]  ;;  %s2693_s30 = smov %s2121_s10 }
0x14ae   : > { %s2691_s21 = sld [smem:[#allocation6_spill]] }
0x14af   : > { %s2692_s11 = sld [smem:[#allocation8_spill]] }
0x14b3   : > { %p19_p9 = scmp.ge.s32.totalorder %s2690_s12, 4  }
0x14b4   : > { %s2694_s10 = smov %s2691_s21 }
0x14b5   :  { %21 = sbr.rel (!%p19_p9) target bundleno = 5 (0x5), region = 114 }
0x14ba   :  { %1726 = vsyncpa [#allocation3], 1 }
0x14bb   :  { %1728 = vsyncpa [#allocation3 + $0x1], 1 }

</bundles_post_ra>
